<compile_context>
chip_gen: v5e
topology: v5e:2x2
jax: 0.10.0
libtpu: 0.0.40
codegen_flags: <defaults>
</compile_context>

<pallas_src>
import jax
import jax.numpy as jnp
from jax.experimental import pallas as pl
from jax.experimental.pallas import tpu as pltpu

# ---------------- synthetic BERT config (small) ----------------
VOCAB = 100
VOCAB_PAD = 128          # lane-padded vocab for the in-kernel one-hot embedding matmul
TYPE_VOCAB = 2
MAX_POS = 64
HIDDEN = 32
N_HEADS = 2
HEAD_DIM = HIDDEN // N_HEADS
FFN = 64
N_LAYERS = 2
NUM_CLASSES = 28
CLS_PAD = 128            # lane-dense padded classifier width
LN_EPS = 1e-12
BATCH = 2
SEQ = 8

SLAB_ROWS_PER_LAYER = 8  # b_qkv, bo, ln1_g, ln1_b, bf1, bf2, ln2_g, ln2_b
SLAB_ROWS = 3 + N_LAYERS * SLAB_ROWS_PER_LAYER  # + emb_ln_g, emb_ln_b, cls_b


# ---------------- shared math helpers (pure jnp; used inside kernel and ref) ----------------
def _gelu(x):
    # TODO(synk): HF BERT uses exact erf-GELU; tanh approximation used here for guaranteed Mosaic lowering.
    c = 0.7978845608028654  # sqrt(2/pi)
    return 0.5 * x * (1.0 + jnp.tanh(c * (x + 0.044715 * x * x * x)))


def _layernorm(x, gamma, beta):
    mu = jnp.mean(x, axis=-1, keepdims=True)
    var = jnp.mean((x - mu) ** 2, axis=-1, keepdims=True)
    return (x - mu) * jax.lax.rsqrt(var + LN_EPS) * gamma + beta


# ---------------- the single fused Pallas kernel ----------------
def fused_bert_kernel(ids_ref, wemb_ref, pt_ref, mask_ref, slab_ref,
                      wqkv_ref, wo_ref, w1_ref, w2_ref, clsw_ref, out_ref):
    BS = BATCH * SEQ
    scale = 1.0 / (HEAD_DIM ** 0.5)
    f32 = jnp.float32
    bf16 = jnp.bfloat16

    # ---- embedding lookup folded into the kernel: exact one-hot matmul against padded table ----
    lane = jax.lax.broadcasted_iota(jnp.int32, (BS, VOCAB_PAD), 1)
    onehot = (lane == ids_ref[...]).astype(f32)                       # (BS, 128), exact 0/1
    x = jnp.dot(onehot, wemb_ref[...], preferred_element_type=f32)    # exact row gather
    x = x + pt_ref[...]                                               # + position + token-type emb

    emb_g = slab_ref[0:1, 0:HIDDEN]
    emb_b = slab_ref[1:2, 0:HIDDEN]
    h = _layernorm(x, emb_g, emb_b)                                   # (BS, H) f32

    mask = mask_ref[...]                                              # (BS, BS) block-diag + key-pad bias

    for l in range(N_LAYERS):
        base = 3 + l * SLAB_ROWS_PER_LAYER
        b_qkv = slab_ref[base + 0:base + 1, 0:3 * HIDDEN]
        bo    = slab_ref[base + 1:base + 2, 0:HIDDEN]
        g1    = slab_ref[base + 2:base + 3, 0:HIDDEN]
        be1   = slab_ref[base + 3:base + 4, 0:HIDDEN]
        bf1   = slab_ref[base + 4:base + 5, 0:FFN]
        bf2   = slab_ref[base + 5:base + 6, 0:HIDDEN]
        g2    = slab_ref[base + 6:base + 7, 0:HIDDEN]
        be2   = slab_ref[base + 7:base + 8, 0:HIDDEN]

        # ---- fused QKV projection: ONE (BS,32)@(32,96) bf16 MXU matmul ----
        qkv = jnp.dot(h.astype(bf16), wqkv_ref[l],
                      preferred_element_type=f32) + b_qkv             # (BS, 96) f32
        q = qkv[:, 0:HIDDEN]
        k = qkv[:, HIDDEN:2 * HIDDEN]
        v = qkv[:, 2 * HIDDEN:3 * HIDDEN]

        # ---- attention over all B*S tokens at once (block-diagonal mask), heads unrolled ----
        ctx_heads = []
        for hd in range(N_HEADS):
            cols = slice(hd * HEAD_DIM, (hd + 1) * HEAD_DIM)
            qh = q[:, cols].astype(bf16)                              # (BS, HD)
            kh = k[:, cols].astype(bf16)
            vh = v[:, cols].astype(bf16)
            # contract the last dims of both operands (q @ k^T) -- no explicit K transpose
            s = jax.lax.dot_general(qh, kh, (((1,), (1,)), ((), ())),
                                    preferred_element_type=f32) * scale + mask   # (BS, BS)
            s = s - jnp.max(s, axis=-1, keepdims=True)
            p = jnp.exp(s)
            p = p * pl.reciprocal(jnp.sum(p, axis=-1, keepdims=True), approx=True)
            ctx_heads.append(jnp.dot(p.astype(bf16), vh,
                                     preferred_element_type=f32))     # (BS, HD)
        ctx = jnp.concatenate(ctx_heads, axis=-1)                     # (BS, H)

        # ---- output projection: a single (BS,32)@(32,32) matmul ----
        attn = jnp.dot(ctx.astype(bf16), wo_ref[l],
                       preferred_element_type=f32) + bo

        h1 = _layernorm(h + attn, g1, be1)
        ff = _gelu(jnp.dot(h1.astype(bf16), w1_ref[l], preferred_element_type=f32) + bf1)
        ff = jnp.dot(ff.astype(bf16), w2_ref[l], preferred_element_type=f32) + bf2
        h = _layernorm(h1 + ff, g2, be2)

    # classifier on all tokens, lane-dense (BS, 128) unmasked store.
    # kept f32: one tiny matmul, avoids bf16 rounding of the final logits.
    cls_b = slab_ref[2:3, :]
    out_ref[...] = jnp.dot(h, clsw_ref[...], preferred_element_type=f32) + cls_b


# ---------------- wrapper ----------------
_VMEM = pl.BlockSpec(memory_space=pltpu.MemorySpace.VMEM)


def pack_params(params):
    """One-time packing of the parameter pytree into a handful of kernel-friendly arrays."""
    layers = params["layers"]

    def _row(v):
        v = v.reshape(1, -1)
        return jnp.pad(v, ((0, 0), (0, 128 - v.shape[1])))

    rows = [_row(params["emb_ln_g"]), _row(params["emb_ln_b"]), _row(params["cls_b"])]
    wqkv, wo, w1, w2 = [], [], [], []
    for (Wq, bq, Wk, bk, Wv, bv, Wo, bo, g1, be1, W1, bf1, W2, bf2, g2, be2) in layers:
        wqkv.append(jnp.concatenate([Wq, Wk, Wv], axis=1))            # (H, 3H)
        wo.append(Wo)
        w1.append(W1)
        w2.append(W2)
        rows += [_row(jnp.concatenate([bq, bk, bv], axis=1)),
                 _row(bo), _row(g1), _row(be1),
                 _row(bf1), _row(bf2), _row(g2), _row(be2)]

    return {
        "wemb": jnp.pad(params["word_emb"], ((0, VOCAB_PAD - VOCAB), (0, 0))),       # (128, H) f32
        # position ids are 0..S-1 and token_type_ids are all zero (matches the PyTorch module)
        "pos_type": jnp.tile(params["pos_emb"][:SEQ] + params["type_emb"][0][None, :],
                             (BATCH, 1)),                                            # (B*S, H) f32
        "slab": jnp.concatenate(rows, axis=0),                                       # (19, 128) f32
        "wqkv": jnp.stack(wqkv).astype(jnp.bfloat16),                                # (L, H, 3H)
        "wo": jnp.stack(wo).astype(jnp.bfloat16),                                    # (L, H, H)
        "w1": jnp.stack(w1).astype(jnp.bfloat16),                                    # (L, H, FFN)
        "w2": jnp.stack(w2).astype(jnp.bfloat16),                                    # (L, FFN, H)
        "clsw": jnp.pad(params["cls_w"], ((0, 0), (0, CLS_PAD - NUM_CLASSES))),      # (H, 128) f32
    }


@jax.jit
def bert_classifier_forward(input_ids, attention_mask, packed):
    B, S = input_ids.shape
    BS = B * S
    ids2d = input_ids.reshape(BS, 1).astype(jnp.int32)

    # block-diagonal (cross-batch = -1e9) + key-padding additive attention bias, (BS, BS)
    batch_of = jnp.repeat(jnp.arange(B), S)
    cross = jnp.where(batch_of[:, None] == batch_of[None, :], 0.0, -1e9)
    key_pad = ((1.0 - attention_mask.astype(jnp.float32)) * -1e9).reshape(1, BS)
    mask2d = (cross + key_pad).astype(jnp.float32)

    args = [ids2d, packed["wemb"], packed["pos_type"], mask2d, packed["slab"],
            packed["wqkv"], packed["wo"], packed["w1"], packed["w2"], packed["clsw"]]

    out = pl.pallas_call(
        fused_bert_kernel,
        out_shape=jax.ShapeDtypeStruct((BS, CLS_PAD), jnp.float32),
        in_specs=[_VMEM] * len(args),
        out_specs=_VMEM,
    )(*args)

    # CLS token ([:, 0, :]) and un-pad the classifier lanes.
    return out.reshape(B, S, CLS_PAD)[:, 0, :NUM_CLASSES]


# ---------------- parameter init (deterministic, synthetic) ----------------
def init_params(key):
    keys = iter(jax.random.split(key, 128))
    std = 0.02

    def w(shape):
        return jax.random.normal(next(keys), shape, jnp.float32) * std

    def zeros(shape):
        return jnp.zeros(shape, jnp.float32)

    def ones(shape):
        return jnp.ones(shape, jnp.float32)

    layers = []
    for _ in range(N_LAYERS):
        layers.append((
            w((HIDDEN, HIDDEN)), zeros((1, HIDDEN)),   # Wq, bq  (stored as (in, out))
            w((HIDDEN, HIDDEN)), zeros((1, HIDDEN)),   # Wk, bk
            w((HIDDEN, HIDDEN)), zeros((1, HIDDEN)),   # Wv, bv
            w((HIDDEN, HIDDEN)), zeros((1, HIDDEN)),   # Wo, bo
            ones((1, HIDDEN)), zeros((1, HIDDEN)),     # LN1 gamma, beta
            w((HIDDEN, FFN)), zeros((1, FFN)),         # FFN in
            w((FFN, HIDDEN)), zeros((1, HIDDEN)),      # FFN out
            ones((1, HIDDEN)), zeros((1, HIDDEN)),     # LN2 gamma, beta
        ))

    return {
        "word_emb": w((VOCAB, HIDDEN)),
        "pos_emb": w((MAX_POS, HIDDEN)),
        "type_emb": w((TYPE_VOCAB, HIDDEN)),
        "emb_ln_g": ones((1, HIDDEN)),
        "emb_ln_b": zeros((1, HIDDEN)),
        "layers": layers,
        "cls_w": w((HIDDEN, NUM_CLASSES)),             # classifier (in, out)
        "cls_b": zeros((1, NUM_CLASSES)),
    }


# ---------------- pure-JAX reference for verification ----------------
def ref_forward(input_ids, attention_mask, params):
    B, S = input_ids.shape
    emb = (params["word_emb"][input_ids]
           + params["pos_emb"][jnp.arange(S)][None, :, :]
           + params["type_emb"][jnp.zeros_like(input_ids)])
    h = _layernorm(emb, params["emb_ln_g"], params["emb_ln_b"])
    mask = (1.0 - attention_mask.astype(jnp.float32)) * -1e9
    for (wq, bq, wk, bk, wv, bv, wo, bo, g1, be1, w1, bf1, w2, bf2, g2, be2) in params["layers"]:
        q = (h @ wq + bq).reshape(B, S, N_HEADS, HEAD_DIM).transpose(0, 2, 1, 3)
        k = (h @ wk + bk).reshape(B, S, N_HEADS, HEAD_DIM).transpose(0, 2, 1, 3)
        v = (h @ wv + bv).reshape(B, S, N_HEADS, HEAD_DIM).transpose(0, 2, 1, 3)
        s = jnp.einsum("bhqd,bhkd->bhqk", q, k) / (HEAD_DIM ** 0.5) + mask[:, None, None, :]
        p = jax.nn.softmax(s, axis=-1)
        ctx = jnp.einsum("bhqk,bhkd->bhqd", p, v).transpose(0, 2, 1, 3).reshape(B, S, HIDDEN)
        attn = ctx @ wo + bo
        h1 = _layernorm(h + attn, g1, be1)
        ff = _gelu(h1 @ w1 + bf1) @ w2 + bf2
        h = _layernorm(h1 + ff, g2, be2)
    return h[:, 0, :] @ params["cls_w"] + params["cls_b"]


if __name__ == "__main__":
    root = jax.random.PRNGKey(0)
    k_params, k_ids = jax.random.split(root)

    params = init_params(k_params)
    packed = pack_params(params)          # one-time packing; not on the forward path

    input_ids = jax.random.randint(k_ids, (BATCH, SEQ), 0, VOCAB, dtype=jnp.int32)
    attention_mask = jnp.array([[1] * SEQ, [1] * (SEQ - 2) + [0] * 2], dtype=jnp.int32)

    logits = bert_classifier_forward(input_ids, attention_mask, packed)
    logits = jax.block_until_ready(logits)

    ref = ref_forward(input_ids, attention_mask, params)
    assert logits.shape == (BATCH, NUM_CLASSES), logits.shape
    # tolerance relaxed vs exact f32 math: transformer matmul operands run in bf16 on the MXU
    # (f32 accumulation) and the softmax denominator uses the EUP approximate reciprocal.
    err = float(jnp.max(jnp.abs(logits - ref)))
    assert jnp.allclose(logits, ref, rtol=1e-2, atol=5e-3), err

    print("KERNEL_OK")
</pallas_src>

<mosaic_0001>
module attributes {stable_mosaic.version = 11 : i64} {
  func.func @fused_bert_kernel(%arg0: memref<16x1xi32, #tpu.memory_space<vmem>>, %arg1: memref<128x32xf32, #tpu.memory_space<vmem>>, %arg2: memref<16x32xf32, #tpu.memory_space<vmem>>, %arg3: memref<16x16xf32, #tpu.memory_space<vmem>>, %arg4: memref<19x128xf32, #tpu.memory_space<vmem>>, %arg5: memref<2x32x96xbf16, #tpu.memory_space<vmem>>, %arg6: memref<2x32x32xbf16, #tpu.memory_space<vmem>>, %arg7: memref<2x32x64xbf16, #tpu.memory_space<vmem>>, %arg8: memref<2x64x32xbf16, #tpu.memory_space<vmem>>, %arg9: memref<32x128xf32, #tpu.memory_space<vmem>>, %arg10: memref<16x128xf32, #tpu.memory_space<vmem>>) attributes {dimension_semantics = [], scalar_prefetch = 0 : i64, scratch_operands = 0 : i64, tpu.core_type = #tpu.core_type<tc>} {
    %0 = tpu.iota {dimensions = array<i32: 1>} : vector<16x128xi32>
    %c0 = arith.constant 0 : index
    %c0_0 = arith.constant 0 : index
    %1 = vector.load %arg0[%c0, %c0_0] : memref<16x1xi32, #tpu.memory_space<vmem>>, vector<16x1xi32>
    %2 = vector.broadcast %1 : vector<16x1xi32> to vector<16x128xi32>
    %3 = arith.cmpi eq, %0, %2 : vector<16x128xi32>
    %4 = arith.extui %3 : vector<16x128xi1> to vector<16x128xi32>
    %5 = arith.sitofp %4 : vector<16x128xi32> to vector<16x128xf32>
    %c0_1 = arith.constant 0 : index
    %c0_2 = arith.constant 0 : index
    %6 = vector.load %arg1[%c0_1, %c0_2] : memref<128x32xf32, #tpu.memory_space<vmem>>, vector<128x32xf32>
    %cst = arith.constant dense<0.000000e+00> : vector<16x32xf32>
    %7 = tpu.matmul %5, %6, %cst {dimension_numbers = #tpu.dot_dimension_numbers<[1], [0], [0], [1], [0, 0, 1, 1], [], []>} : vector<16x128xf32>, vector<128x32xf32>, vector<16x32xf32> -> vector<16x32xf32>
    %c0_3 = arith.constant 0 : index
    %c0_4 = arith.constant 0 : index
    %8 = vector.load %arg2[%c0_3, %c0_4] : memref<16x32xf32, #tpu.memory_space<vmem>>, vector<16x32xf32>
    %9 = arith.addf %7, %8 : vector<16x32xf32>
    %c0_5 = arith.constant 0 : index
    %c0_6 = arith.constant 0 : index
    %10 = vector.load %arg4[%c0_5, %c0_6] : memref<19x128xf32, #tpu.memory_space<vmem>>, vector<1x32xf32>
    %c1 = arith.constant 1 : index
    %c0_7 = arith.constant 0 : index
    %11 = vector.load %arg4[%c1, %c0_7] : memref<19x128xf32, #tpu.memory_space<vmem>>, vector<1x32xf32>
    %cst_8 = arith.constant dense<0.000000e+00> : vector<16xf32>
    %12 = vector.multi_reduction <add>, %9, %cst_8 [1] : vector<16x32xf32> to vector<16xf32>
    %13 = vector.shape_cast %12 : vector<16xf32> to vector<16x1xf32>
    %cst_9 = arith.constant 3.200000e+01 : f32
    %14 = vector.broadcast %cst_9 : f32 to vector<16x1xf32>
    %15 = arith.divf %13, %14 : vector<16x1xf32>
    %16 = vector.broadcast %15 : vector<16x1xf32> to vector<16x32xf32>
    %17 = arith.subf %9, %16 : vector<16x32xf32>
    %18 = arith.mulf %17, %17 : vector<16x32xf32>
    %cst_10 = arith.constant dense<0.000000e+00> : vector<16xf32>
    %19 = vector.multi_reduction <add>, %18, %cst_10 [1] : vector<16x32xf32> to vector<16xf32>
    %20 = vector.shape_cast %19 : vector<16xf32> to vector<16x1xf32>
    %cst_11 = arith.constant 3.200000e+01 : f32
    %21 = vector.broadcast %cst_11 : f32 to vector<16x1xf32>
    %22 = arith.divf %20, %21 : vector<16x1xf32>
    %23 = vector.broadcast %15 : vector<16x1xf32> to vector<16x32xf32>
    %24 = arith.subf %9, %23 : vector<16x32xf32>
    %cst_12 = arith.constant 9.99999996E-13 : f32
    %25 = vector.broadcast %cst_12 : f32 to vector<16x1xf32>
    %26 = arith.addf %22, %25 : vector<16x1xf32>
    %27 = math.rsqrt %26 : vector<16x1xf32>
    %28 = vector.broadcast %27 : vector<16x1xf32> to vector<16x32xf32>
    %29 = arith.mulf %24, %28 : vector<16x32xf32>
    %30 = vector.broadcast %10 : vector<1x32xf32> to vector<16x32xf32>
    %31 = arith.mulf %29, %30 : vector<16x32xf32>
    %32 = vector.broadcast %11 : vector<1x32xf32> to vector<16x32xf32>
    %33 = arith.addf %31, %32 : vector<16x32xf32>
    %c0_13 = arith.constant 0 : index
    %c0_14 = arith.constant 0 : index
    %34 = vector.load %arg3[%c0_13, %c0_14] : memref<16x16xf32, #tpu.memory_space<vmem>>, vector<16x16xf32>
    %c3 = arith.constant 3 : index
    %c0_15 = arith.constant 0 : index
    %35 = vector.load %arg4[%c3, %c0_15] : memref<19x128xf32, #tpu.memory_space<vmem>>, vector<1x96xf32>
    %c4 = arith.constant 4 : index
    %c0_16 = arith.constant 0 : index
    %36 = vector.load %arg4[%c4, %c0_16] : memref<19x128xf32, #tpu.memory_space<vmem>>, vector<1x32xf32>
    %c5 = arith.constant 5 : index
    %c0_17 = arith.constant 0 : index
    %37 = vector.load %arg4[%c5, %c0_17] : memref<19x128xf32, #tpu.memory_space<vmem>>, vector<1x32xf32>
    %c6 = arith.constant 6 : index
    %c0_18 = arith.constant 0 : index
    %38 = vector.load %arg4[%c6, %c0_18] : memref<19x128xf32, #tpu.memory_space<vmem>>, vector<1x32xf32>
    %c7 = arith.constant 7 : index
    %c0_19 = arith.constant 0 : index
    %39 = vector.load %arg4[%c7, %c0_19] : memref<19x128xf32, #tpu.memory_space<vmem>>, vector<1x64xf32>
    %c8 = arith.constant 8 : index
    %c0_20 = arith.constant 0 : index
    %40 = vector.load %arg4[%c8, %c0_20] : memref<19x128xf32, #tpu.memory_space<vmem>>, vector<1x32xf32>
    %c9 = arith.constant 9 : index
    %c0_21 = arith.constant 0 : index
    %41 = vector.load %arg4[%c9, %c0_21] : memref<19x128xf32, #tpu.memory_space<vmem>>, vector<1x32xf32>
    %c10 = arith.constant 10 : index
    %c0_22 = arith.constant 0 : index
    %42 = vector.load %arg4[%c10, %c0_22] : memref<19x128xf32, #tpu.memory_space<vmem>>, vector<1x32xf32>
    %43 = arith.truncf %33 : vector<16x32xf32> to vector<16x32xbf16>
    %c0_23 = arith.constant 0 : index
    %c0_24 = arith.constant 0 : index
    %c0_25 = arith.constant 0 : index
    %44 = vector.load %arg5[%c0_23, %c0_24, %c0_25] : memref<2x32x96xbf16, #tpu.memory_space<vmem>>, vector<1x32x96xbf16>
    %45 = vector.shape_cast %44 : vector<1x32x96xbf16> to vector<32x96xbf16>
    %cst_26 = arith.constant dense<0.000000e+00> : vector<16x96xf32>
    %46 = tpu.matmul %43, %45, %cst_26 {dimension_numbers = #tpu.dot_dimension_numbers<[1], [0], [0], [1], [0, 0, 1, 1], [], []>} : vector<16x32xbf16>, vector<32x96xbf16>, vector<16x96xf32> -> vector<16x96xf32>
    %47 = vector.broadcast %35 : vector<1x96xf32> to vector<16x96xf32>
    %48 = arith.addf %46, %47 : vector<16x96xf32>
    %49 = vector.extract_strided_slice %48 {offsets = [0, 0], sizes = [16, 32], strides = [1, 1]} : vector<16x96xf32> to vector<16x32xf32>
    %50 = vector.extract_strided_slice %48 {offsets = [0, 32], sizes = [16, 32], strides = [1, 1]} : vector<16x96xf32> to vector<16x32xf32>
    %51 = vector.extract_strided_slice %48 {offsets = [0, 64], sizes = [16, 32], strides = [1, 1]} : vector<16x96xf32> to vector<16x32xf32>
    %52 = vector.extract_strided_slice %49 {offsets = [0, 0], sizes = [16, 16], strides = [1, 1]} : vector<16x32xf32> to vector<16x16xf32>
    %53 = arith.truncf %52 : vector<16x16xf32> to vector<16x16xbf16>
    %54 = vector.extract_strided_slice %50 {offsets = [0, 0], sizes = [16, 16], strides = [1, 1]} : vector<16x32xf32> to vector<16x16xf32>
    %55 = arith.truncf %54 : vector<16x16xf32> to vector<16x16xbf16>
    %56 = vector.extract_strided_slice %51 {offsets = [0, 0], sizes = [16, 16], strides = [1, 1]} : vector<16x32xf32> to vector<16x16xf32>
    %57 = arith.truncf %56 : vector<16x16xf32> to vector<16x16xbf16>
    %cst_27 = arith.constant dense<0.000000e+00> : vector<16x16xf32>
    %58 = tpu.matmul %53, %55, %cst_27 {dimension_numbers = #tpu.dot_dimension_numbers<[1], [1], [0], [0], [0, 0, 1, 0], [], []>} : vector<16x16xbf16>, vector<16x16xbf16>, vector<16x16xf32> -> vector<16x16xf32>
    %cst_28 = arith.constant 2.500000e-01 : f32
    %59 = vector.broadcast %cst_28 : f32 to vector<16x16xf32>
    %60 = arith.mulf %58, %59 : vector<16x16xf32>
    %61 = arith.addf %60, %34 : vector<16x16xf32>
    %cst_29 = arith.constant dense<0xFF800000> : vector<16xf32>
    %62 = vector.multi_reduction <maximumf>, %61, %cst_29 [1] : vector<16x16xf32> to vector<16xf32>
    %63 = vector.shape_cast %62 : vector<16xf32> to vector<16x1xf32>
    %64 = vector.broadcast %63 : vector<16x1xf32> to vector<16x16xf32>
    %65 = arith.subf %61, %64 : vector<16x16xf32>
    %66 = math.exp %65 : vector<16x16xf32>
    %cst_30 = arith.constant dense<0.000000e+00> : vector<16xf32>
    %67 = vector.multi_reduction <add>, %66, %cst_30 [1] : vector<16x16xf32> to vector<16xf32>
    %68 = vector.shape_cast %67 : vector<16xf32> to vector<16x1xf32>
    %69 = tpu.reciprocal %68 {approx = true} : vector<16x1xf32> -> vector<16x1xf32>
    %70 = vector.broadcast %69 : vector<16x1xf32> to vector<16x16xf32>
    %71 = arith.mulf %66, %70 : vector<16x16xf32>
    %72 = arith.truncf %71 : vector<16x16xf32> to vector<16x16xbf16>
    %cst_31 = arith.constant dense<0.000000e+00> : vector<16x16xf32>
    %73 = tpu.matmul %72, %57, %cst_31 {dimension_numbers = #tpu.dot_dimension_numbers<[1], [0], [0], [1], [0, 0, 1, 1], [], []>} : vector<16x16xbf16>, vector<16x16xbf16>, vector<16x16xf32> -> vector<16x16xf32>
    %74 = vector.extract_strided_slice %49 {offsets = [0, 16], sizes = [16, 16], strides = [1, 1]} : vector<16x32xf32> to vector<16x16xf32>
    %75 = arith.truncf %74 : vector<16x16xf32> to vector<16x16xbf16>
    %76 = vector.extract_strided_slice %50 {offsets = [0, 16], sizes = [16, 16], strides = [1, 1]} : vector<16x32xf32> to vector<16x16xf32>
    %77 = arith.truncf %76 : vector<16x16xf32> to vector<16x16xbf16>
    %78 = vector.extract_strided_slice %51 {offsets = [0, 16], sizes = [16, 16], strides = [1, 1]} : vector<16x32xf32> to vector<16x16xf32>
    %79 = arith.truncf %78 : vector<16x16xf32> to vector<16x16xbf16>
    %cst_32 = arith.constant dense<0.000000e+00> : vector<16x16xf32>
    %80 = tpu.matmul %75, %77, %cst_32 {dimension_numbers = #tpu.dot_dimension_numbers<[1], [1], [0], [0], [0, 0, 1, 0], [], []>} : vector<16x16xbf16>, vector<16x16xbf16>, vector<16x16xf32> -> vector<16x16xf32>
    %cst_33 = arith.constant 2.500000e-01 : f32
    %81 = vector.broadcast %cst_33 : f32 to vector<16x16xf32>
    %82 = arith.mulf %80, %81 : vector<16x16xf32>
    %83 = arith.addf %82, %34 : vector<16x16xf32>
    %cst_34 = arith.constant dense<0xFF800000> : vector<16xf32>
    %84 = vector.multi_reduction <maximumf>, %83, %cst_34 [1] : vector<16x16xf32> to vector<16xf32>
    %85 = vector.shape_cast %84 : vector<16xf32> to vector<16x1xf32>
    %86 = vector.broadcast %85 : vector<16x1xf32> to vector<16x16xf32>
    %87 = arith.subf %83, %86 : vector<16x16xf32>
    %88 = math.exp %87 : vector<16x16xf32>
    %cst_35 = arith.constant dense<0.000000e+00> : vector<16xf32>
    %89 = vector.multi_reduction <add>, %88, %cst_35 [1] : vector<16x16xf32> to vector<16xf32>
    %90 = vector.shape_cast %89 : vector<16xf32> to vector<16x1xf32>
    %91 = tpu.reciprocal %90 {approx = true} : vector<16x1xf32> -> vector<16x1xf32>
    %92 = vector.broadcast %91 : vector<16x1xf32> to vector<16x16xf32>
    %93 = arith.mulf %88, %92 : vector<16x16xf32>
    %94 = arith.truncf %93 : vector<16x16xf32> to vector<16x16xbf16>
    %cst_36 = arith.constant dense<0.000000e+00> : vector<16x16xf32>
    %95 = tpu.matmul %94, %79, %cst_36 {dimension_numbers = #tpu.dot_dimension_numbers<[1], [0], [0], [1], [0, 0, 1, 1], [], []>} : vector<16x16xbf16>, vector<16x16xbf16>, vector<16x16xf32> -> vector<16x16xf32>
    %96 = tpu.concatenate %73, %95 in 1 : vector<16x16xf32>, vector<16x16xf32> -> vector<16x32xf32>
    %97 = arith.truncf %96 : vector<16x32xf32> to vector<16x32xbf16>
    %c0_37 = arith.constant 0 : index
    %c0_38 = arith.constant 0 : index
    %c0_39 = arith.constant 0 : index
    %98 = vector.load %arg6[%c0_37, %c0_38, %c0_39] : memref<2x32x32xbf16, #tpu.memory_space<vmem>>, vector<1x32x32xbf16>
    %99 = vector.shape_cast %98 : vector<1x32x32xbf16> to vector<32x32xbf16>
    %cst_40 = arith.constant dense<0.000000e+00> : vector<16x32xf32>
    %100 = tpu.matmul %97, %99, %cst_40 {dimension_numbers = #tpu.dot_dimension_numbers<[1], [0], [0], [1], [0, 0, 1, 1], [], []>} : vector<16x32xbf16>, vector<32x32xbf16>, vector<16x32xf32> -> vector<16x32xf32>
    %101 = vector.broadcast %36 : vector<1x32xf32> to vector<16x32xf32>
    %102 = arith.addf %100, %101 : vector<16x32xf32>
    %103 = arith.addf %33, %102 : vector<16x32xf32>
    %cst_41 = arith.constant dense<0.000000e+00> : vector<16xf32>
    %104 = vector.multi_reduction <add>, %103, %cst_41 [1] : vector<16x32xf32> to vector<16xf32>
    %105 = vector.shape_cast %104 : vector<16xf32> to vector<16x1xf32>
    %cst_42 = arith.constant 3.200000e+01 : f32
    %106 = vector.broadcast %cst_42 : f32 to vector<16x1xf32>
    %107 = arith.divf %105, %106 : vector<16x1xf32>
    %108 = vector.broadcast %107 : vector<16x1xf32> to vector<16x32xf32>
    %109 = arith.subf %103, %108 : vector<16x32xf32>
    %110 = arith.mulf %109, %109 : vector<16x32xf32>
    %cst_43 = arith.constant dense<0.000000e+00> : vector<16xf32>
    %111 = vector.multi_reduction <add>, %110, %cst_43 [1] : vector<16x32xf32> to vector<16xf32>
    %112 = vector.shape_cast %111 : vector<16xf32> to vector<16x1xf32>
    %cst_44 = arith.constant 3.200000e+01 : f32
    %113 = vector.broadcast %cst_44 : f32 to vector<16x1xf32>
    %114 = arith.divf %112, %113 : vector<16x1xf32>
    %115 = vector.broadcast %107 : vector<16x1xf32> to vector<16x32xf32>
    %116 = arith.subf %103, %115 : vector<16x32xf32>
    %cst_45 = arith.constant 9.99999996E-13 : f32
    %117 = vector.broadcast %cst_45 : f32 to vector<16x1xf32>
    %118 = arith.addf %114, %117 : vector<16x1xf32>
    %119 = math.rsqrt %118 : vector<16x1xf32>
    %120 = vector.broadcast %119 : vector<16x1xf32> to vector<16x32xf32>
    %121 = arith.mulf %116, %120 : vector<16x32xf32>
    %122 = vector.broadcast %37 : vector<1x32xf32> to vector<16x32xf32>
    %123 = arith.mulf %121, %122 : vector<16x32xf32>
    %124 = vector.broadcast %38 : vector<1x32xf32> to vector<16x32xf32>
    %125 = arith.addf %123, %124 : vector<16x32xf32>
    %126 = arith.truncf %125 : vector<16x32xf32> to vector<16x32xbf16>
    %c0_46 = arith.constant 0 : index
    %c0_47 = arith.constant 0 : index
    %c0_48 = arith.constant 0 : index
    %127 = vector.load %arg7[%c0_46, %c0_47, %c0_48] : memref<2x32x64xbf16, #tpu.memory_space<vmem>>, vector<1x32x64xbf16>
    %128 = vector.shape_cast %127 : vector<1x32x64xbf16> to vector<32x64xbf16>
    %cst_49 = arith.constant dense<0.000000e+00> : vector<16x64xf32>
    %129 = tpu.matmul %126, %128, %cst_49 {dimension_numbers = #tpu.dot_dimension_numbers<[1], [0], [0], [1], [0, 0, 1, 1], [], []>} : vector<16x32xbf16>, vector<32x64xbf16>, vector<16x64xf32> -> vector<16x64xf32>
    %130 = vector.broadcast %39 : vector<1x64xf32> to vector<16x64xf32>
    %131 = arith.addf %129, %130 : vector<16x64xf32>
    %cst_50 = arith.constant 5.000000e-01 : f32
    %132 = vector.broadcast %cst_50 : f32 to vector<16x64xf32>
    %133 = arith.mulf %132, %131 : vector<16x64xf32>
    %cst_51 = arith.constant 4.471500e-02 : f32
    %134 = vector.broadcast %cst_51 : f32 to vector<16x64xf32>
    %135 = arith.mulf %134, %131 : vector<16x64xf32>
    %136 = arith.mulf %135, %131 : vector<16x64xf32>
    %137 = arith.mulf %136, %131 : vector<16x64xf32>
    %138 = arith.addf %131, %137 : vector<16x64xf32>
    %cst_52 = arith.constant 0.797884583 : f32
    %139 = vector.broadcast %cst_52 : f32 to vector<16x64xf32>
    %140 = arith.mulf %139, %138 : vector<16x64xf32>
    %141 = math.tanh %140 : vector<16x64xf32>
    %cst_53 = arith.constant 1.000000e+00 : f32
    %142 = vector.broadcast %cst_53 : f32 to vector<16x64xf32>
    %143 = arith.addf %142, %141 : vector<16x64xf32>
    %144 = arith.mulf %133, %143 : vector<16x64xf32>
    %145 = arith.truncf %144 : vector<16x64xf32> to vector<16x64xbf16>
    %c0_54 = arith.constant 0 : index
    %c0_55 = arith.constant 0 : index
    %c0_56 = arith.constant 0 : index
    %146 = vector.load %arg8[%c0_54, %c0_55, %c0_56] : memref<2x64x32xbf16, #tpu.memory_space<vmem>>, vector<1x64x32xbf16>
    %147 = vector.shape_cast %146 : vector<1x64x32xbf16> to vector<64x32xbf16>
    %cst_57 = arith.constant dense<0.000000e+00> : vector<16x32xf32>
    %148 = tpu.matmul %145, %147, %cst_57 {dimension_numbers = #tpu.dot_dimension_numbers<[1], [0], [0], [1], [0, 0, 1, 1], [], []>} : vector<16x64xbf16>, vector<64x32xbf16>, vector<16x32xf32> -> vector<16x32xf32>
    %149 = vector.broadcast %40 : vector<1x32xf32> to vector<16x32xf32>
    %150 = arith.addf %148, %149 : vector<16x32xf32>
    %151 = arith.addf %125, %150 : vector<16x32xf32>
    %cst_58 = arith.constant dense<0.000000e+00> : vector<16xf32>
    %152 = vector.multi_reduction <add>, %151, %cst_58 [1] : vector<16x32xf32> to vector<16xf32>
    %153 = vector.shape_cast %152 : vector<16xf32> to vector<16x1xf32>
    %cst_59 = arith.constant 3.200000e+01 : f32
    %154 = vector.broadcast %cst_59 : f32 to vector<16x1xf32>
    %155 = arith.divf %153, %154 : vector<16x1xf32>
    %156 = vector.broadcast %155 : vector<16x1xf32> to vector<16x32xf32>
    %157 = arith.subf %151, %156 : vector<16x32xf32>
    %158 = arith.mulf %157, %157 : vector<16x32xf32>
    %cst_60 = arith.constant dense<0.000000e+00> : vector<16xf32>
    %159 = vector.multi_reduction <add>, %158, %cst_60 [1] : vector<16x32xf32> to vector<16xf32>
    %160 = vector.shape_cast %159 : vector<16xf32> to vector<16x1xf32>
    %cst_61 = arith.constant 3.200000e+01 : f32
    %161 = vector.broadcast %cst_61 : f32 to vector<16x1xf32>
    %162 = arith.divf %160, %161 : vector<16x1xf32>
    %163 = vector.broadcast %155 : vector<16x1xf32> to vector<16x32xf32>
    %164 = arith.subf %151, %163 : vector<16x32xf32>
    %cst_62 = arith.constant 9.99999996E-13 : f32
    %165 = vector.broadcast %cst_62 : f32 to vector<16x1xf32>
    %166 = arith.addf %162, %165 : vector<16x1xf32>
    %167 = math.rsqrt %166 : vector<16x1xf32>
    %168 = vector.broadcast %167 : vector<16x1xf32> to vector<16x32xf32>
    %169 = arith.mulf %164, %168 : vector<16x32xf32>
    %170 = vector.broadcast %41 : vector<1x32xf32> to vector<16x32xf32>
    %171 = arith.mulf %169, %170 : vector<16x32xf32>
    %172 = vector.broadcast %42 : vector<1x32xf32> to vector<16x32xf32>
    %173 = arith.addf %171, %172 : vector<16x32xf32>
    %c11 = arith.constant 11 : index
    %c0_63 = arith.constant 0 : index
    %174 = vector.load %arg4[%c11, %c0_63] : memref<19x128xf32, #tpu.memory_space<vmem>>, vector<1x96xf32>
    %c12 = arith.constant 12 : index
    %c0_64 = arith.constant 0 : index
    %175 = vector.load %arg4[%c12, %c0_64] : memref<19x128xf32, #tpu.memory_space<vmem>>, vector<1x32xf32>
    %c13 = arith.constant 13 : index
    %c0_65 = arith.constant 0 : index
    %176 = vector.load %arg4[%c13, %c0_65] : memref<19x128xf32, #tpu.memory_space<vmem>>, vector<1x32xf32>
    %c14 = arith.constant 14 : index
    %c0_66 = arith.constant 0 : index
    %177 = vector.load %arg4[%c14, %c0_66] : memref<19x128xf32, #tpu.memory_space<vmem>>, vector<1x32xf32>
    %c15 = arith.constant 15 : index
    %c0_67 = arith.constant 0 : index
    %178 = vector.load %arg4[%c15, %c0_67] : memref<19x128xf32, #tpu.memory_space<vmem>>, vector<1x64xf32>
    %c16 = arith.constant 16 : index
    %c0_68 = arith.constant 0 : index
    %179 = vector.load %arg4[%c16, %c0_68] : memref<19x128xf32, #tpu.memory_space<vmem>>, vector<1x32xf32>
    %c17 = arith.constant 17 : index
    %c0_69 = arith.constant 0 : index
    %180 = vector.load %arg4[%c17, %c0_69] : memref<19x128xf32, #tpu.memory_space<vmem>>, vector<1x32xf32>
    %c18 = arith.constant 18 : index
    %c0_70 = arith.constant 0 : index
    %181 = vector.load %arg4[%c18, %c0_70] : memref<19x128xf32, #tpu.memory_space<vmem>>, vector<1x32xf32>
    %182 = arith.truncf %173 : vector<16x32xf32> to vector<16x32xbf16>
    %c1_71 = arith.constant 1 : index
    %c0_72 = arith.constant 0 : index
    %c0_73 = arith.constant 0 : index
    %183 = vector.load %arg5[%c1_71, %c0_72, %c0_73] : memref<2x32x96xbf16, #tpu.memory_space<vmem>>, vector<1x32x96xbf16>
    %184 = vector.shape_cast %183 : vector<1x32x96xbf16> to vector<32x96xbf16>
    %cst_74 = arith.constant dense<0.000000e+00> : vector<16x96xf32>
    %185 = tpu.matmul %182, %184, %cst_74 {dimension_numbers = #tpu.dot_dimension_numbers<[1], [0], [0], [1], [0, 0, 1, 1], [], []>} : vector<16x32xbf16>, vector<32x96xbf16>, vector<16x96xf32> -> vector<16x96xf32>
    %186 = vector.broadcast %174 : vector<1x96xf32> to vector<16x96xf32>
    %187 = arith.addf %185, %186 : vector<16x96xf32>
    %188 = vector.extract_strided_slice %187 {offsets = [0, 0], sizes = [16, 32], strides = [1, 1]} : vector<16x96xf32> to vector<16x32xf32>
    %189 = vector.extract_strided_slice %187 {offsets = [0, 32], sizes = [16, 32], strides = [1, 1]} : vector<16x96xf32> to vector<16x32xf32>
    %190 = vector.extract_strided_slice %187 {offsets = [0, 64], sizes = [16, 32], strides = [1, 1]} : vector<16x96xf32> to vector<16x32xf32>
    %191 = vector.extract_strided_slice %188 {offsets = [0, 0], sizes = [16, 16], strides = [1, 1]} : vector<16x32xf32> to vector<16x16xf32>
    %192 = arith.truncf %191 : vector<16x16xf32> to vector<16x16xbf16>
    %193 = vector.extract_strided_slice %189 {offsets = [0, 0], sizes = [16, 16], strides = [1, 1]} : vector<16x32xf32> to vector<16x16xf32>
    %194 = arith.truncf %193 : vector<16x16xf32> to vector<16x16xbf16>
    %195 = vector.extract_strided_slice %190 {offsets = [0, 0], sizes = [16, 16], strides = [1, 1]} : vector<16x32xf32> to vector<16x16xf32>
    %196 = arith.truncf %195 : vector<16x16xf32> to vector<16x16xbf16>
    %cst_75 = arith.constant dense<0.000000e+00> : vector<16x16xf32>
    %197 = tpu.matmul %192, %194, %cst_75 {dimension_numbers = #tpu.dot_dimension_numbers<[1], [1], [0], [0], [0, 0, 1, 0], [], []>} : vector<16x16xbf16>, vector<16x16xbf16>, vector<16x16xf32> -> vector<16x16xf32>
    %cst_76 = arith.constant 2.500000e-01 : f32
    %198 = vector.broadcast %cst_76 : f32 to vector<16x16xf32>
    %199 = arith.mulf %197, %198 : vector<16x16xf32>
    %200 = arith.addf %199, %34 : vector<16x16xf32>
    %cst_77 = arith.constant dense<0xFF800000> : vector<16xf32>
    %201 = vector.multi_reduction <maximumf>, %200, %cst_77 [1] : vector<16x16xf32> to vector<16xf32>
    %202 = vector.shape_cast %201 : vector<16xf32> to vector<16x1xf32>
    %203 = vector.broadcast %202 : vector<16x1xf32> to vector<16x16xf32>
    %204 = arith.subf %200, %203 : vector<16x16xf32>
    %205 = math.exp %204 : vector<16x16xf32>
    %cst_78 = arith.constant dense<0.000000e+00> : vector<16xf32>
    %206 = vector.multi_reduction <add>, %205, %cst_78 [1] : vector<16x16xf32> to vector<16xf32>
    %207 = vector.shape_cast %206 : vector<16xf32> to vector<16x1xf32>
    %208 = tpu.reciprocal %207 {approx = true} : vector<16x1xf32> -> vector<16x1xf32>
    %209 = vector.broadcast %208 : vector<16x1xf32> to vector<16x16xf32>
    %210 = arith.mulf %205, %209 : vector<16x16xf32>
    %211 = arith.truncf %210 : vector<16x16xf32> to vector<16x16xbf16>
    %cst_79 = arith.constant dense<0.000000e+00> : vector<16x16xf32>
    %212 = tpu.matmul %211, %196, %cst_79 {dimension_numbers = #tpu.dot_dimension_numbers<[1], [0], [0], [1], [0, 0, 1, 1], [], []>} : vector<16x16xbf16>, vector<16x16xbf16>, vector<16x16xf32> -> vector<16x16xf32>
    %213 = vector.extract_strided_slice %188 {offsets = [0, 16], sizes = [16, 16], strides = [1, 1]} : vector<16x32xf32> to vector<16x16xf32>
    %214 = arith.truncf %213 : vector<16x16xf32> to vector<16x16xbf16>
    %215 = vector.extract_strided_slice %189 {offsets = [0, 16], sizes = [16, 16], strides = [1, 1]} : vector<16x32xf32> to vector<16x16xf32>
    %216 = arith.truncf %215 : vector<16x16xf32> to vector<16x16xbf16>
    %217 = vector.extract_strided_slice %190 {offsets = [0, 16], sizes = [16, 16], strides = [1, 1]} : vector<16x32xf32> to vector<16x16xf32>
    %218 = arith.truncf %217 : vector<16x16xf32> to vector<16x16xbf16>
    %cst_80 = arith.constant dense<0.000000e+00> : vector<16x16xf32>
    %219 = tpu.matmul %214, %216, %cst_80 {dimension_numbers = #tpu.dot_dimension_numbers<[1], [1], [0], [0], [0, 0, 1, 0], [], []>} : vector<16x16xbf16>, vector<16x16xbf16>, vector<16x16xf32> -> vector<16x16xf32>
    %cst_81 = arith.constant 2.500000e-01 : f32
    %220 = vector.broadcast %cst_81 : f32 to vector<16x16xf32>
    %221 = arith.mulf %219, %220 : vector<16x16xf32>
    %222 = arith.addf %221, %34 : vector<16x16xf32>
    %cst_82 = arith.constant dense<0xFF800000> : vector<16xf32>
    %223 = vector.multi_reduction <maximumf>, %222, %cst_82 [1] : vector<16x16xf32> to vector<16xf32>
    %224 = vector.shape_cast %223 : vector<16xf32> to vector<16x1xf32>
    %225 = vector.broadcast %224 : vector<16x1xf32> to vector<16x16xf32>
    %226 = arith.subf %222, %225 : vector<16x16xf32>
    %227 = math.exp %226 : vector<16x16xf32>
    %cst_83 = arith.constant dense<0.000000e+00> : vector<16xf32>
    %228 = vector.multi_reduction <add>, %227, %cst_83 [1] : vector<16x16xf32> to vector<16xf32>
    %229 = vector.shape_cast %228 : vector<16xf32> to vector<16x1xf32>
    %230 = tpu.reciprocal %229 {approx = true} : vector<16x1xf32> -> vector<16x1xf32>
    %231 = vector.broadcast %230 : vector<16x1xf32> to vector<16x16xf32>
    %232 = arith.mulf %227, %231 : vector<16x16xf32>
    %233 = arith.truncf %232 : vector<16x16xf32> to vector<16x16xbf16>
    %cst_84 = arith.constant dense<0.000000e+00> : vector<16x16xf32>
    %234 = tpu.matmul %233, %218, %cst_84 {dimension_numbers = #tpu.dot_dimension_numbers<[1], [0], [0], [1], [0, 0, 1, 1], [], []>} : vector<16x16xbf16>, vector<16x16xbf16>, vector<16x16xf32> -> vector<16x16xf32>
    %235 = tpu.concatenate %212, %234 in 1 : vector<16x16xf32>, vector<16x16xf32> -> vector<16x32xf32>
    %236 = arith.truncf %235 : vector<16x32xf32> to vector<16x32xbf16>
    %c1_85 = arith.constant 1 : index
    %c0_86 = arith.constant 0 : index
    %c0_87 = arith.constant 0 : index
    %237 = vector.load %arg6[%c1_85, %c0_86, %c0_87] : memref<2x32x32xbf16, #tpu.memory_space<vmem>>, vector<1x32x32xbf16>
    %238 = vector.shape_cast %237 : vector<1x32x32xbf16> to vector<32x32xbf16>
    %cst_88 = arith.constant dense<0.000000e+00> : vector<16x32xf32>
    %239 = tpu.matmul %236, %238, %cst_88 {dimension_numbers = #tpu.dot_dimension_numbers<[1], [0], [0], [1], [0, 0, 1, 1], [], []>} : vector<16x32xbf16>, vector<32x32xbf16>, vector<16x32xf32> -> vector<16x32xf32>
    %240 = vector.broadcast %175 : vector<1x32xf32> to vector<16x32xf32>
    %241 = arith.addf %239, %240 : vector<16x32xf32>
    %242 = arith.addf %173, %241 : vector<16x32xf32>
    %cst_89 = arith.constant dense<0.000000e+00> : vector<16xf32>
    %243 = vector.multi_reduction <add>, %242, %cst_89 [1] : vector<16x32xf32> to vector<16xf32>
    %244 = vector.shape_cast %243 : vector<16xf32> to vector<16x1xf32>
    %cst_90 = arith.constant 3.200000e+01 : f32
    %245 = vector.broadcast %cst_90 : f32 to vector<16x1xf32>
    %246 = arith.divf %244, %245 : vector<16x1xf32>
    %247 = vector.broadcast %246 : vector<16x1xf32> to vector<16x32xf32>
    %248 = arith.subf %242, %247 : vector<16x32xf32>
    %249 = arith.mulf %248, %248 : vector<16x32xf32>
    %cst_91 = arith.constant dense<0.000000e+00> : vector<16xf32>
    %250 = vector.multi_reduction <add>, %249, %cst_91 [1] : vector<16x32xf32> to vector<16xf32>
    %251 = vector.shape_cast %250 : vector<16xf32> to vector<16x1xf32>
    %cst_92 = arith.constant 3.200000e+01 : f32
    %252 = vector.broadcast %cst_92 : f32 to vector<16x1xf32>
    %253 = arith.divf %251, %252 : vector<16x1xf32>
    %254 = vector.broadcast %246 : vector<16x1xf32> to vector<16x32xf32>
    %255 = arith.subf %242, %254 : vector<16x32xf32>
    %cst_93 = arith.constant 9.99999996E-13 : f32
    %256 = vector.broadcast %cst_93 : f32 to vector<16x1xf32>
    %257 = arith.addf %253, %256 : vector<16x1xf32>
    %258 = math.rsqrt %257 : vector<16x1xf32>
    %259 = vector.broadcast %258 : vector<16x1xf32> to vector<16x32xf32>
    %260 = arith.mulf %255, %259 : vector<16x32xf32>
    %261 = vector.broadcast %176 : vector<1x32xf32> to vector<16x32xf32>
    %262 = arith.mulf %260, %261 : vector<16x32xf32>
    %263 = vector.broadcast %177 : vector<1x32xf32> to vector<16x32xf32>
    %264 = arith.addf %262, %263 : vector<16x32xf32>
    %265 = arith.truncf %264 : vector<16x32xf32> to vector<16x32xbf16>
    %c1_94 = arith.constant 1 : index
    %c0_95 = arith.constant 0 : index
    %c0_96 = arith.constant 0 : index
    %266 = vector.load %arg7[%c1_94, %c0_95, %c0_96] : memref<2x32x64xbf16, #tpu.memory_space<vmem>>, vector<1x32x64xbf16>
    %267 = vector.shape_cast %266 : vector<1x32x64xbf16> to vector<32x64xbf16>
    %cst_97 = arith.constant dense<0.000000e+00> : vector<16x64xf32>
    %268 = tpu.matmul %265, %267, %cst_97 {dimension_numbers = #tpu.dot_dimension_numbers<[1], [0], [0], [1], [0, 0, 1, 1], [], []>} : vector<16x32xbf16>, vector<32x64xbf16>, vector<16x64xf32> -> vector<16x64xf32>
    %269 = vector.broadcast %178 : vector<1x64xf32> to vector<16x64xf32>
    %270 = arith.addf %268, %269 : vector<16x64xf32>
    %cst_98 = arith.constant 5.000000e-01 : f32
    %271 = vector.broadcast %cst_98 : f32 to vector<16x64xf32>
    %272 = arith.mulf %271, %270 : vector<16x64xf32>
    %cst_99 = arith.constant 4.471500e-02 : f32
    %273 = vector.broadcast %cst_99 : f32 to vector<16x64xf32>
    %274 = arith.mulf %273, %270 : vector<16x64xf32>
    %275 = arith.mulf %274, %270 : vector<16x64xf32>
    %276 = arith.mulf %275, %270 : vector<16x64xf32>
    %277 = arith.addf %270, %276 : vector<16x64xf32>
    %cst_100 = arith.constant 0.797884583 : f32
    %278 = vector.broadcast %cst_100 : f32 to vector<16x64xf32>
    %279 = arith.mulf %278, %277 : vector<16x64xf32>
    %280 = math.tanh %279 : vector<16x64xf32>
    %cst_101 = arith.constant 1.000000e+00 : f32
    %281 = vector.broadcast %cst_101 : f32 to vector<16x64xf32>
    %282 = arith.addf %281, %280 : vector<16x64xf32>
    %283 = arith.mulf %272, %282 : vector<16x64xf32>
    %284 = arith.truncf %283 : vector<16x64xf32> to vector<16x64xbf16>
    %c1_102 = arith.constant 1 : index
    %c0_103 = arith.constant 0 : index
    %c0_104 = arith.constant 0 : index
    %285 = vector.load %arg8[%c1_102, %c0_103, %c0_104] : memref<2x64x32xbf16, #tpu.memory_space<vmem>>, vector<1x64x32xbf16>
    %286 = vector.shape_cast %285 : vector<1x64x32xbf16> to vector<64x32xbf16>
    %cst_105 = arith.constant dense<0.000000e+00> : vector<16x32xf32>
    %287 = tpu.matmul %284, %286, %cst_105 {dimension_numbers = #tpu.dot_dimension_numbers<[1], [0], [0], [1], [0, 0, 1, 1], [], []>} : vector<16x64xbf16>, vector<64x32xbf16>, vector<16x32xf32> -> vector<16x32xf32>
    %288 = vector.broadcast %179 : vector<1x32xf32> to vector<16x32xf32>
    %289 = arith.addf %287, %288 : vector<16x32xf32>
    %290 = arith.addf %264, %289 : vector<16x32xf32>
    %cst_106 = arith.constant dense<0.000000e+00> : vector<16xf32>
    %291 = vector.multi_reduction <add>, %290, %cst_106 [1] : vector<16x32xf32> to vector<16xf32>
    %292 = vector.shape_cast %291 : vector<16xf32> to vector<16x1xf32>
    %cst_107 = arith.constant 3.200000e+01 : f32
    %293 = vector.broadcast %cst_107 : f32 to vector<16x1xf32>
    %294 = arith.divf %292, %293 : vector<16x1xf32>
    %295 = vector.broadcast %294 : vector<16x1xf32> to vector<16x32xf32>
    %296 = arith.subf %290, %295 : vector<16x32xf32>
    %297 = arith.mulf %296, %296 : vector<16x32xf32>
    %cst_108 = arith.constant dense<0.000000e+00> : vector<16xf32>
    %298 = vector.multi_reduction <add>, %297, %cst_108 [1] : vector<16x32xf32> to vector<16xf32>
    %299 = vector.shape_cast %298 : vector<16xf32> to vector<16x1xf32>
    %cst_109 = arith.constant 3.200000e+01 : f32
    %300 = vector.broadcast %cst_109 : f32 to vector<16x1xf32>
    %301 = arith.divf %299, %300 : vector<16x1xf32>
    %302 = vector.broadcast %294 : vector<16x1xf32> to vector<16x32xf32>
    %303 = arith.subf %290, %302 : vector<16x32xf32>
    %cst_110 = arith.constant 9.99999996E-13 : f32
    %304 = vector.broadcast %cst_110 : f32 to vector<16x1xf32>
    %305 = arith.addf %301, %304 : vector<16x1xf32>
    %306 = math.rsqrt %305 : vector<16x1xf32>
    %307 = vector.broadcast %306 : vector<16x1xf32> to vector<16x32xf32>
    %308 = arith.mulf %303, %307 : vector<16x32xf32>
    %309 = vector.broadcast %180 : vector<1x32xf32> to vector<16x32xf32>
    %310 = arith.mulf %308, %309 : vector<16x32xf32>
    %311 = vector.broadcast %181 : vector<1x32xf32> to vector<16x32xf32>
    %312 = arith.addf %310, %311 : vector<16x32xf32>
    %c2 = arith.constant 2 : index
    %c0_111 = arith.constant 0 : index
    %313 = vector.load %arg4[%c2, %c0_111] : memref<19x128xf32, #tpu.memory_space<vmem>>, vector<1x128xf32>
    %c0_112 = arith.constant 0 : index
    %c0_113 = arith.constant 0 : index
    %314 = vector.load %arg9[%c0_112, %c0_113] : memref<32x128xf32, #tpu.memory_space<vmem>>, vector<32x128xf32>
    %cst_114 = arith.constant dense<0.000000e+00> : vector<16x128xf32>
    %315 = tpu.matmul %312, %314, %cst_114 {dimension_numbers = #tpu.dot_dimension_numbers<[1], [0], [0], [1], [0, 0, 1, 1], [], []>} : vector<16x32xf32>, vector<32x128xf32>, vector<16x128xf32> -> vector<16x128xf32>
    %316 = vector.broadcast %313 : vector<1x128xf32> to vector<16x128xf32>
    %317 = arith.addf %315, %316 : vector<16x128xf32>
    %c0_115 = arith.constant 0 : index
    %c0_116 = arith.constant 0 : index
    %318 = vector.load %arg10[%c0_115, %c0_116] : memref<16x128xf32, #tpu.memory_space<vmem>>, vector<16x128xf32>
    tpu.vector_store %arg10[%c0_115, %c0_116], %317 {strides = array<i32>} : memref<16x128xf32, #tpu.memory_space<vmem>>, vector<16x128xf32>,
    return
  }
}

</mosaic_0001>

<bundles_post_ra>
// kernel: eq.8
= control target key start
LH: loop header
LB: loop body
LE: loop exit
PB: predicated region body
PF: predicated region fallthrough
CT: control target
= control target key end

     0   :  { %vm7_vm0 = vcmask 64512   ;;  %vm13_vm1 = vcmask 130112   ;;  %s39_s0 = inlined_call_operand.vmem [shape: s32[2,8], index: 0, kind: input, shape index: {}]   ;;  %s40_s1 = inlined_call_operand.vmem [shape: s32[16], index: 1, kind: output, shape index: {}]  }
   0x1   :  { %v4_v0 = vld [vmem:[%s39_s0] sm:$0x3]  ;;  %s22_s0 = smov 8  }
   0x2   :  { %5 = vst [vmem:[#allocation1] sm:$0x3] %v4_v0 }
   0x9   :  { %v10_v1 = vld [vmem:[#allocation1 + $0x1] sm:$0x1]   ;;  %v6_v2 = vld [vmem:[#allocation1] sm:$0x1]  }
   0xa   :  { %11 = vrot.lane.b32.xlu0 %v10_v1, %s22_s0  ;;  %8 = vst.msk [vmem:[#allocation0] sm:$0x1] %vm7_vm0, %v6_v2  }
  0x7c   :  { %v12_v3 = vpop.permute.xlu0 %11  }
  0x7d   :  { %14 = vst.msk [vmem:[#allocation0] sm:$0x1] %vm13_vm1, %v12_v3  }
  0x84   :  { %v17_v4 = vld [vmem:[#allocation0] sm:$0x1] }
  0x85   :  { %20 = vst [vmem:[%s40_s1] sm:$0x1] %v17_v4 }

// kernel: bert_classifier_forward.1
= control target key start
LH: loop header
LB: loop body
LE: loop exit
PB: predicated region body
PF: predicated region fallthrough
CT: control target
= control target key end

     0   :  { %v1321_v0 = vmov 0   ;;  %v36_v19 = vlaneseq  ;;  %v1322_v22 = vmov 1.0   ;;  %vm95_vm2 = vcmask 261120   ;;  %s1324_s19 = smov 96   ;;  %s1325_s24 = smov 64   ;;  %s1718_s0 = inlined_call_operand.vmem [shape: s32[16,1], index: 0, kind: input, shape index: {}]   ;;  %s1719_s1 = inlined_call_operand.vmem [shape: f32[128,32], index: 1, kind: input, shape index: {}]   ;;  %s1720_s2 = inlined_call_operand.vmem [shape: f32[16,32], index: 2, kind: input, shape index: {}]   ;;  %s1721_s4 = inlined_call_operand.vmem [shape: f32[19,128], index: 4, kind: input, shape index: {}]   ;;  %s1722_s5 = inlined_call_operand.vmem [shape: bf16[2,32,96], index: 5, kind: input, shape index: {}]   ;;  %s1723_s3 = inlined_call_operand.vmem [shape: f32[16,16], index: 3, kind: input, shape index: {}]   ;;  %s1724_s6 = inlined_call_operand.vmem [shape: bf16[2,32,32], index: 6, kind: input, shape index: {}]   ;;  %s1725_s7 = inlined_call_operand.vmem [shape: bf16[2,32,64], index: 7, kind: input, shape index: {}]   ;;  %s1726_s8 = inlined_call_operand.vmem [shape: bf16[2,64,32], index: 8, kind: input, shape index: {}]   ;;  %s1727_s9 = inlined_call_operand.vmem [shape: f32[32,128], index: 9, kind: input, shape index: {}]   ;;  %s1728_s10 = inlined_call_operand.vmem [shape: f32[16,128], index: 10, kind: output, shape index: {}]  }
   0x1   :  { %1229 = vset.pattern.permute.xlu0 %v1321_v0  ;;  %v38_v1 = vld [vmem:[%s1718_s0] sm:$0xff]  ;;  %v67_v2 = vld [vmem:[%s1719_s1 + $0x78] sm:$0xff]  ;;  %v66_v3 = vld [vmem:[%s1719_s1 + $0x70] sm:$0xff]  ;;  %v1323_v32 = vmov 32.0   ;;  %vm202_vm10 = vcmask 130048   ;;  %s1326_s25 = smov 112  }
   0x2   :  { %41 = vperm.xlu0 %1229, %v38_v1   ;;  %70 = vmatpush.msra.mxu0 %v67_v2  ;;  %v65_v4 = vld [vmem:[%s1719_s1 + $0x68] sm:$0xff]  ;;  %v64_v5 = vld [vmem:[%s1719_s1 + $0x60] sm:$0xff]  ;;  %v63_v7 = vld [vmem:[%s1719_s1 + $0x58] sm:$0xff]  ;;  %v37_v20 = vand.u32 127, %v36_v19  ;;  %1259 = vrcp.f32 %v1323_v32  ;;  %s1328_s26 = smov 48   ;;  %s1329_s29 = smov 16  }
   0x3   :  { %v39_v6 = vld [vmem:[%s1718_s0 + $0x8] sm:$0xff]  ;;  %v62_v8 = vld [vmem:[%s1719_s1 + $0x50] sm:$0xff]  ;;  %v60_v10 = vld [vmem:[%s1719_s1 + $0x40] sm:$0xff] }
   0x4   :  { %71 = vmatpush.msra.mxu0 %v66_v3  ;;  %v61_v9 = vld [vmem:[%s1719_s1 + $0x48] sm:$0xff]  ;;  %v59_v11 = vld [vmem:[%s1719_s1 + $0x38] sm:$0xff]  ;;  %v58_v12 = vld [vmem:[%s1719_s1 + $0x30] sm:$0xff] }
   0x5   :  { %v57_v13 = vld [vmem:[%s1719_s1 + $0x28] sm:$0xff]  ;;  %v56_v14 = vld [vmem:[%s1719_s1 + $0x20] sm:$0xff]  ;;  %v55_v15 = vld [vmem:[%s1719_s1 + $0x18] sm:$0xff] }
   0x6   :  { %72 = vmatpush.msra.mxu0 %v65_v4  ;;  %v54_v16 = vld [vmem:[%s1719_s1 + $0x10] sm:$0xff]  ;;  %v53_v17 = vld [vmem:[%s1719_s1 + $0x8] sm:$0xff]  ;;  %v52_v18 = vld [vmem:[%s1719_s1] sm:$0xff] }
   0x7   :  { %v68_v24 = vld [vmem:[%s1720_s2] sm:$0xff]  ;;  %v69_v28 = vld [vmem:[%s1720_s2 + $0x8] sm:$0xff] }
   0x8   :  { %73 = vmatpush.msra.mxu0 %v64_v5  ;;  %v1260_v33 = vpop.eup %1259  ;;  %v1201_v49 = vld [vmem:[%s1722_s5 + $0x8] sm:$0xff]  ;;  %v1200_v51 = vld [vmem:[%s1722_s5] sm:$0xff] }
   0x9   :  { %v103_v34 = vmul.f32 32.0, %v1260_v33  ;;  %vm107_vm3 = vweird.f32 %v1260_v33  ;;  %190 = vmatpush.bf16.msra.mxu1 %v1201_v49 }
   0xa   :  { %44 = vperm.xlu0 %1229, %v39_v6   ;;  %74 = vmatpush.msra.mxu0 %v63_v7  ;;  %v1240_v6 = vld [vmem:[%s1721_s4] ss:$0 sm:$0xff] }
   0xb   :  { %v104_v35 = vsub.f32 1.0, %v103_v34 }
   0xc   :  { %75 = vmatpush.msra.mxu0 %v62_v8 }
   0xd   :  { %v105_v36 = vmul.f32 %v1260_v33, %v104_v35  ;;  %191 = vmatpush.bf16.msra.mxu1 %v1200_v51 }
   0xe   :  { %76 = vmatpush.msra.mxu0 %v61_v9 }
   0xf   :  { %v106_v37 = vadd.f32 %v1260_v33, %v105_v36 }
  0x10   :  { %77 = vmatpush.msra.mxu0 %v60_v10 }
  0x11   :  { %v1447_v38 = vsel %vm107_vm3, %v1260_v33, %v106_v37 }
  0x12   :  { %78 = vmatpush.msra.mxu0 %v59_v11  ;;  %v1241_v11 = vld [vmem:[%s1721_s4 + $0x1] ss:$0 sm:$0xff] }
  0x14   :  { %79 = vmatpush.msra.mxu0 %v58_v12 }
  0x16   :  { %80 = vmatpush.msra.mxu0 %v57_v13 }
  0x18   :  { %81 = vmatpush.msra.mxu0 %v56_v14 }
  0x1a   :  { %82 = vmatpush.msra.mxu0 %v55_v15 }
  0x1c   :  { %83 = vmatpush.msra.mxu0 %v54_v16 }
  0x1e   :  { %84 = vmatpush.msra.mxu0 %v53_v17  ;;  %v1242_v17 = vld [vmem:[%s1721_s4 + $0x3] ss:$0 sm:$0xff] }
  0x20   :  { %85 = vmatpush.msra.mxu0 %v52_v18 }
  0x74   :  { %v42_v21 = vpop.permute.xlu0 %41 }
  0x75   :  { %vm46_vm0 = vcmp.eq.s32.totalorder %v37_v20, %v42_v21 }
  0x76   :  { %1080 = vmatmul.msk.f32.vlgmr.msra.gmra.mxu0 %vm46_vm0, %v1322_v22 }
  0x7c   :  { %v45_v23 = vpop.permute.xlu0 %44 }
  0x7d   :  { %vm47_vm1 = vcmp.eq.s32.totalorder %v37_v20, %v45_v23 }
  0x7e   :  { %1081 = vmatmul.msk.f32.gmra.mxu0 %vm47_vm1, %v1322_v22  ;;  %vm525_vm1 = vcmask 523264  }
  0xf3   :  { %v87_v25 = vpop.f32.mrf.mxu0 }
  0xf4   :  { %v88_v26 = vadd.f32 %v87_v25, %v68_v24  ;;  %v1487_v25 = vld [vmem:[%s1723_s3] sm:$0xff] }
  0xf6   :  { %v96_v27 = vsel %vm95_vm2, %v88_v26, 0.0 }
  0xf7   :  { %97 = vadd.xlane.f32.xlu1 %v96_v27 }
  0xfb   :  { %v90_v29 = vpop.f32.mrf.mxu0 }
  0xfc   :  { %v91_v30 = vadd.f32 %v90_v29, %v69_v28 }
  0xfe   :  { %v99_v31 = vsel %vm95_vm2, %v91_v30, 0.0 }
  0xff   :  { %100 = vadd.xlane.f32.xlu1 %v99_v31 }
 0x16a   :  { %v98_v39 = vpop.xlane.xlu1 %97 }
 0x16b   :  { %v109_v40 = vmul.f32 %v1447_v38, %v98_v39 }
 0x16d   :  { %v111_v41 = vsub.f32 %v88_v26, %v109_v40 }
 0x16f   :  { %v113_v42 = vmul.f32 %v111_v41, %v111_v41 }
 0x171   :  { %v115_v43 = vsel %vm95_vm2, %v113_v42, 0.0 }
 0x172   :  { %116 = vadd.xlane.f32.xlu2 %v115_v43  ;;  %v101_v44 = vpop.xlane.xlu1 %100 }
 0x173   :  { %v110_v45 = vmul.f32 %v1447_v38, %v101_v44 }
 0x175   :  { %v112_v46 = vsub.f32 %v91_v30, %v110_v45  ;;  %v1494_v30 = vld [vmem:[%s1723_s3 + $0x8] sm:$0xff]  ;;  %s1327_s3 = smov 80  }
 0x177   :  { %v114_v47 = vmul.f32 %v112_v46, %v112_v46 }
 0x179   :  { %v118_v48 = vsel %vm95_vm2, %v114_v47, 0.0 }
 0x17a   :  { %119 = vadd.xlane.f32.xlu2 %v118_v48 }
 0x1e5   :  { %v117_v50 = vpop.xlane.xlu2 %116 }
 0x1e6   :  { %v121_v52 = vmul.f32 %v117_v50, %v1447_v38 }
 0x1e8   :  { %v123_v53 = vadd.f32 1e-12, %v121_v52 }
 0x1ea   :  { %1261 = vrsqrt.f32 %v123_v53  ;;  %vm131_vm5 = vweird.f32 %v123_v53 }
 0x1ed   :  { %v120_v54 = vpop.xlane.xlu2 %119 }
 0x1ee   :  { %v122_v55 = vmul.f32 %v120_v54, %v1447_v38 }
 0x1f0   :  { %v1262_v56 = vpop.eup %1261  ;;  %v124_v57 = vadd.f32 1e-12, %v122_v55 }
 0x1f1   :  { %v126_v58 = vmul.f32 %v1262_v56, %v123_v53  ;;  %vm132_vm4 = vweird.f32 %v1262_v56 }
 0x1f2   :  { %1263 = vrsqrt.f32 %v124_v57  ;;  %vm133_vm6 = vmor %vm131_vm5, %vm132_vm4  ;;  %vm141_vm8 = vweird.f32 %v124_v57 }
 0x1f3   :  { %v127_v59 = vmul.f32 %v1262_v56, %v126_v58 }
 0x1f5   :  { %v128_v60 = vmul.f32 0.5, %v127_v59 }
 0x1f7   :  { %v129_v61 = vsub.f32 1.5, %v128_v60 }
 0x1f8   :  { %v1264_v62 = vpop.eup %1263 }
 0x1f9   :  { %v130_v63 = vmul.f32 %v1262_v56, %v129_v61  ;;  %v136_v0 = vmul.f32 %v1264_v62, %v124_v57  ;;  %vm142_vm7 = vweird.f32 %v1264_v62 }
 0x1fa   :  { %vm143_vm9 = vmor %vm141_vm8, %vm142_vm7 }
 0x1fb   :  { %v137_v1 = vmul.f32 %v1264_v62, %v136_v0  ;;  %v134_v2 = vsel %vm133_vm6, %v1262_v56, %v130_v63 }
 0x1fc   :  { %v145_v5 = vmul.f32 %v134_v2, %v111_v41 }
 0x1fd   :  { %v138_v3 = vmul.f32 0.5, %v137_v1 }
 0x1fe   :  { %v148_v10 = vmul.f32 %v1240_v6, %v145_v5 }
 0x1ff   :  { %v139_v4 = vsub.f32 1.5, %v138_v3 }
 0x200   :  { %v1467_v13 = vadd.f32 %v1241_v11, %v148_v10 }
 0x201   :  { %v140_v7 = vmul.f32 %v1264_v62, %v139_v4 }
 0x203   :  { %v144_v8 = vsel %vm143_vm9, %v1264_v62, %v140_v7 }
 0x204   :  { %v146_v9 = vmul.f32 %v144_v8, %v112_v46 }
 0x206   :  { %v149_v12 = vmul.f32 %v1240_v6, %v146_v9 }
 0x208   :  { %v1469_v14 = vadd.f32 %v1241_v11, %v149_v12 }
 0x20a   :  { %v163_v15 = vpack.c.bf16 %v1469_v14, %v1467_v13 }
 0x20c   :  { %1090 = vmatmul.msk.bf16.vlgmr.msra.gmra.mxu1 %vm95_vm2, %v163_v15 }
 0x289   :  { %v193_v16 = vpop.f32.mrf.mxu1 }
 0x28a   :  { %v194_v19 = vadd.f32 %v1242_v17, %v193_v16 }
 0x291   :  { %v195_v18 = vpop.f32.mrf.mxu1 }
 0x292   :  { %v196_v20 = vadd.f32 %v1242_v17, %v195_v18 }
 0x294   :  { %v1477_v21 = vpack.c.bf16 %v196_v20, %v194_v19 }
 0x296   :  { %200 = vrot.lane.b32.xlu0 %v1477_v21, %s1324_s19 }
 0x308   :  { %v201_v22 = vpop.permute.xlu0 %200 }
 0x309   :  { %v207_v23 = vsel %vm202_vm10, %v201_v22, 0 }
 0x30a   :  { %216 = vmatpush.bf16.xpose.msra.mxu2 %v207_v23  ;;  %v1203_v23 = vld [vmem:[%s1724_s6 + $0x8] sm:$0xff] }
 0x311   :  { %1091 = vmatmul.msk.bf16.vlgmr.msra.gmra.mxu2 %vm202_vm10, %v1477_v21 }
 0x312   :  { %378 = vmatpush.bf16.msrb.mxu2 %v1203_v23  ;;  %v1209_v23 = vld [vmem:[%s1726_s8 + $0x18] sm:$0xff] }
 0x394   :  { %v218_v24 = vpop.f32.mrf.mxu2 }
 0x395   :  { %v223_v26 = vmul.f32 0.25, %v218_v24 }
 0x397   :  { %v225_v27 = vadd.f32 %v223_v26, %v1487_v25 }
 0x399   :  { %v227_v28 = vsel %vm202_vm10, %v225_v27, -inf }
 0x39a   :  { %228 = vmax.xlane.f32.xlu1 %v227_v28 }
 0x39c   :  { %v220_v29 = vpop.f32.mrf.mxu2 }
 0x39d   :  { %v224_v31 = vmul.f32 0.25, %v220_v29 }
 0x39f   :  { %v226_v32 = vadd.f32 %v224_v31, %v1494_v30 }
 0x3a1   :  { %v230_v33 = vsel %vm202_vm10, %v226_v32, -inf }
 0x3a2   :  { %231 = vmax.xlane.f32.xlu2 %v230_v33 }
 0x3ba   :  { %250 = vrot.lane.b32.xlu2 %v1477_v21, %s1325_s24 }
 0x3c2   :  { %270 = vrot.lane.b32.xlu2 %v1477_v21, %s1326_s25 }
 0x40d   :  { %v229_v34 = vpop.xlane.xlu1 %228 }
 0x40e   :  { %v233_v35 = vsub.f32 %v225_v27, %v229_v34  ;;  %v1202_v27 = vld [vmem:[%s1724_s6] sm:$0xff] }
 0x40f   :  { %379 = vmatpush.bf16.msrb.mxu2 %v1202_v27  ;;  %v1246_v27 = vld [vmem:[%s1721_s4 + $0x7] ss:$0 sm:$0xff] }
 0x410   :  { %v235_v36 = vmul.f32 1.442695, %v233_v35  ;;  %v1243_v35 = vld [vmem:[%s1721_s4 + $0x4] ss:$0 sm:$0xff] }
 0x412   :  { %1265 = vpow2.f32 %v235_v36 }
 0x415   :  { %v232_v37 = vpop.xlane.xlu2 %231 }
 0x416   :  { %v234_v39 = vsub.f32 %v226_v32, %v232_v37 }
 0x418   :  { %v1266_v40 = vpop.eup %1265  ;;  %v237_v41 = vmul.f32 1.442695, %v234_v39 }
 0x419   :  { %v239_v42 = vsel %vm202_vm10, %v1266_v40, 0.0 }
 0x41a   :  { %1267 = vpow2.f32 %v237_v41  ;;  %240 = vadd.xlane.f32.xlu0 %v239_v42 }
 0x41d   :  { %v251_v43 = vpop.permute.xlu2 %250 }
 0x41e   :  { %263 = vmatpush.bf16.msra.mxu3 %v251_v43 }
 0x420   :  { %v1268_v44 = vpop.eup %1267 }
 0x421   :  { %v242_v45 = vsel %vm202_vm10, %v1268_v44, 0.0 }
 0x422   :  { %243 = vadd.xlane.f32.xlu1 %v242_v45 }
 0x425   :  { %v271_v55 = vpop.permute.xlu2 %270 }
 0x43b   :  { %272 = vrot.lane.b32.xlu1 %v1477_v21, %s1327_s3 }
 0x48d   :  { %v241_v46 = vpop.xlane.xlu0 %240 }
 0x48e   :  { %1269 = vrcp.f32 %v241_v46 }
 0x494   :  { %v1270_v48 = vpop.eup %1269 }
 0x495   :  { %v244_v47 = vpop.xlane.xlu1 %243  ;;  %v247_v50 = vmul.f32 %v1270_v48, %v1266_v40 }
 0x496   :  { %1271 = vrcp.f32 %v244_v47 }
 0x49c   :  { %v1272_v49 = vpop.eup %1271 }
 0x49d   :  { %v248_v51 = vmul.f32 %v1272_v49, %v1268_v44 }
 0x49f   :  { %v249_v52 = vpack.c.bf16 %v248_v51, %v247_v50 }
 0x4a1   :  { %1092 = vmatmul.msk.bf16.vlgmr.msra.gmra.mxu3 %vm202_vm10, %v249_v52 }
 0x4ad   :  { %v273_v53 = vpop.permute.xlu1 %272 }
 0x4ae   :  { %v278_v54 = vsel %vm202_vm10, %v273_v53, 0 }
 0x4af   :  { %287 = vmatpush.bf16.xpose.msrb.mxu3 %v278_v54 }
 0x4b6   :  { %1093 = vmatmul.msk.bf16.vlgmr.msrb.gmra.mxu3 %vm202_vm10, %v271_v55 }
 0x524   :  { %v265_v56 = vpop.f32.mrf.mxu3 }
 0x52c   :  { %v267_v57 = vpop.f32.mrf.mxu3 }
 0x539   :  { %v289_v58 = vpop.f32.mrf.mxu3 }
 0x53a   :  { %v294_v59 = vmul.f32 0.25, %v289_v58 }
 0x53c   :  { %v296_v60 = vadd.f32 %v294_v59, %v1487_v25 }
 0x53e   :  { %v298_v61 = vsel %vm202_vm10, %v296_v60, -inf }
 0x53f   :  { %299 = vmax.xlane.f32.xlu2 %v298_v61 }
 0x541   :  { %v291_v62 = vpop.f32.mrf.mxu3 }
 0x542   :  { %v295_v63 = vmul.f32 0.25, %v291_v62 }
 0x544   :  { %v297_v0 = vadd.f32 %v295_v63, %v1494_v30 }
 0x546   :  { %v301_v1 = vsel %vm202_vm10, %v297_v0, -inf }
 0x547   :  { %302 = vmax.xlane.f32.xlu1 %v301_v1 }
 0x5b2   :  { %v300_v2 = vpop.xlane.xlu2 %299 }
 0x5b3   :  { %v304_v3 = vsub.f32 %v296_v60, %v300_v2 }
 0x5b5   :  { %v306_v4 = vmul.f32 1.442695, %v304_v3 }
 0x5b7   :  { %1273 = vpow2.f32 %v306_v4 }
 0x5ba   :  { %v303_v5 = vpop.xlane.xlu1 %302 }
 0x5bb   :  { %v305_v6 = vsub.f32 %v297_v0, %v303_v5 }
 0x5bd   :  { %v1274_v7 = vpop.eup %1273  ;;  %v308_v8 = vmul.f32 1.442695, %v305_v6 }
 0x5be   :  { %v310_v9 = vsel %vm202_vm10, %v1274_v7, 0.0 }
 0x5bf   :  { %1275 = vpow2.f32 %v308_v8  ;;  %311 = vadd.xlane.f32.xlu0 %v310_v9  ;;  %v1244_v9 = vld [vmem:[%s1721_s4 + $0x5] ss:$0 sm:$0xff] }
 0x5c5   :  { %v1276_v10 = vpop.eup %1275 }
 0x5c6   :  { %v313_v11 = vsel %vm202_vm10, %v1276_v10, 0.0 }
 0x5c7   :  { %314 = vadd.xlane.f32.xlu0 %v313_v11 }
 0x5db   :  { %321 = vrot.lane.b32.xlu0 %v1477_v21, %s1328_s26 }
 0x632   :  { %v312_v12 = vpop.xlane.xlu0 %311 }
 0x63a   :  { %v315_v15 = vpop.xlane.xlu0 %314 }
 0x63b   :  { %1277 = vrcp.f32 %v315_v15  ;;  %v1245_v15 = vld [vmem:[%s1721_s4 + $0x6] ss:$0 sm:$0xff] }
 0x63c   :  { %1279 = vrcp.f32 %v312_v12 }
 0x641   :  { %v1278_v16 = vpop.eup %1277 }
 0x642   :  { %v1280_v17 = vpop.eup %1279  ;;  %v319_v18 = vmul.f32 %v1278_v16, %v1276_v10 }
 0x643   :  { %v318_v19 = vmul.f32 %v1280_v17, %v1274_v7 }
 0x645   :  { %v320_v22 = vpack.c.bf16 %v319_v18, %v318_v19 }
 0x64d   :  { %v322_v20 = vpop.permute.xlu0 %321 }
 0x64e   :  { %334 = vmatpush.bf16.msrb.mxu1 %v322_v20 }
 0x651   :  { %1094 = vmatmul.msk.bf16.vlgmr.msrb.gmra.mxu1 %vm202_vm10, %v320_v22 }
 0x652   :  { %533 = vmatpush.bf16.msra.mxu1 %v1209_v23 }
 0x6ce   :  { %v336_v24 = vpop.f32.mrf.mxu1 }
 0x6d6   :  { %v338_v21 = vpop.f32.mrf.mxu1 }
 0x6d7   :  { %v1230_v26 = vpack.i.bf16 %v338_v21, %v336_v24  ;;  %v1208_v24 = vld [vmem:[%s1726_s8 + $0x10] sm:$0xff]  ;;  %v1207_v21 = vld [vmem:[%s1726_s8 + $0x8] sm:$0xff] }
 0x6d8   :  { %534 = vmatpush.bf16.msra.mxu1 %v1208_v24 }
 0x6d9   :  { %1231 = vrot.lane.b32.xlu2 %v1230_v26, %s1329_s29  ;;  %v1206_v26 = vld [vmem:[%s1726_s8] sm:$0xff] }
 0x6dc   :  { %535 = vmatpush.bf16.msra.mxu1 %v1207_v21 }
 0x6e0   :  { %536 = vmatpush.bf16.msra.mxu1 %v1206_v26 }
 0x733   :  { %v1232_v28 = vpop.permute.xlu2 %1231 }
 0x734   :  { %v1234_v29 = vunpack.i.h.bf16 %v1232_v28  ;;  %v1233_v31 = vunpack.i.l.bf16 %v1232_v28 }
 0x736   :  { %v350_v32 = vsel %vm202_vm10, %v267_v57, %v1234_v29  ;;  %v349_v33 = vsel %vm202_vm10, %v265_v56, %v1233_v31  ;;  %v1204_v56 = vld [vmem:[%s1725_s7] sm:$0xff] }
 0x737   :  { %v351_v34 = vpack.c.bf16 %v350_v32, %v349_v33 }
 0x739   :  { %1103 = vmatmul.msk.bf16.vlgmr.msrb.gmra.mxu2 %vm95_vm2, %v351_v34 }
 0x7bc   :  { %v381_v36 = vpop.f32.mrf.mxu2 }
 0x7bd   :  { %v382_v37 = vadd.f32 %v1243_v35, %v381_v36 }
 0x7bf   :  { %v386_v39 = vadd.f32 %v382_v37, %v1467_v13 }
 0x7c1   :  { %v388_v40 = vsel %vm95_vm2, %v386_v39, 0.0 }
 0x7c2   :  { %389 = vadd.xlane.f32.xlu1 %v388_v40 }
 0x7c4   :  { %v383_v41 = vpop.f32.mrf.mxu2 }
 0x7c5   :  { %v384_v42 = vadd.f32 %v1243_v35, %v383_v41 }
 0x7c7   :  { %v387_v43 = vadd.f32 %v384_v42, %v1469_v14  ;;  %v1205_v14 = vld [vmem:[%s1725_s7 + $0x8] sm:$0xff] }
 0x7c8   :  { %465 = vmatpush.bf16.msra.mxu3 %v1205_v14 }
 0x7c9   :  { %v391_v44 = vsel %vm95_vm2, %v387_v43, 0.0 }
 0x7ca   :  { %392 = vadd.xlane.f32.xlu0 %v391_v44 }
 0x7cc   :  { %466 = vmatpush.bf16.msra.mxu3 %v1204_v56 }
 0x835   :  { %v390_v45 = vpop.xlane.xlu1 %389 }
 0x836   :  { %v394_v46 = vmul.f32 %v390_v45, %v1447_v38 }
 0x838   :  { %v396_v47 = vsub.f32 %v386_v39, %v394_v46 }
 0x83a   :  { %v398_v48 = vmul.f32 %v396_v47, %v396_v47 }
 0x83c   :  { %v400_v49 = vsel %vm95_vm2, %v398_v48, 0.0 }
 0x83d   :  { %v393_v50 = vpop.xlane.xlu0 %392  ;;  %401 = vadd.xlane.f32.xlu1 %v400_v49 }
 0x83e   :  { %v395_v13 = vmul.f32 %v393_v50, %v1447_v38 }
 0x840   :  { %v397_v51 = vsub.f32 %v387_v43, %v395_v13 }
 0x842   :  { %v399_v52 = vmul.f32 %v397_v51, %v397_v51 }
 0x844   :  { %v403_v53 = vsel %vm95_vm2, %v399_v52, 0.0  ;;  %v1247_v52 = vld [vmem:[%s1721_s4 + $0x8] ss:$0 sm:$0xff] }
 0x845   :  { %404 = vadd.xlane.f32.xlu1 %v403_v53 }
 0x8b0   :  { %v402_v54 = vpop.xlane.xlu1 %401 }
 0x8b1   :  { %v406_v55 = vmul.f32 %v402_v54, %v1447_v38 }
 0x8b3   :  { %v408_v57 = vadd.f32 1e-12, %v406_v55 }
 0x8b5   :  { %1281 = vrsqrt.f32 %v408_v57  ;;  %vm416_vm12 = vweird.f32 %v408_v57 }
 0x8b8   :  { %v405_v58 = vpop.xlane.xlu1 %404 }
 0x8b9   :  { %v407_v59 = vmul.f32 %v405_v58, %v1447_v38 }
 0x8bb   :  { %v1282_v60 = vpop.eup %1281  ;;  %v409_v61 = vadd.f32 1e-12, %v407_v59 }
 0x8bc   :  { %v411_v62 = vmul.f32 %v1282_v60, %v408_v57  ;;  %vm417_vm11 = vweird.f32 %v1282_v60 }
 0x8bd   :  { %1283 = vrsqrt.f32 %v409_v61  ;;  %vm418_vm13 = vmor %vm416_vm12, %vm417_vm11  ;;  %vm426_vm15 = vweird.f32 %v409_v61 }
 0x8be   :  { %v412_v63 = vmul.f32 %v1282_v60, %v411_v62 }
 0x8c0   :  { %v413_v0 = vmul.f32 0.5, %v412_v63 }
 0x8c2   :  { %v414_v1 = vsub.f32 1.5, %v413_v0 }
 0x8c3   :  { %v1284_v2 = vpop.eup %1283 }
 0x8c4   :  { %v415_v3 = vmul.f32 %v1282_v60, %v414_v1  ;;  %v421_v4 = vmul.f32 %v1284_v2, %v409_v61  ;;  %vm427_vm14 = vweird.f32 %v1284_v2 }
 0x8c5   :  { %vm428_vm0 = vmor %vm426_vm15, %vm427_vm14 }
 0x8c6   :  { %v422_v5 = vmul.f32 %v1284_v2, %v421_v4  ;;  %v419_v6 = vsel %vm418_vm13, %v1282_v60, %v415_v3 }
 0x8c7   :  { %v430_v10 = vmul.f32 %v419_v6, %v396_v47  ;;  %v1211_v6 = vld [vmem:[%s1722_s5 + $0x18] sm:$0xff] }
 0x8c8   :  { %v423_v7 = vmul.f32 0.5, %v422_v5  ;;  %631 = vmatpush.bf16.msra.mxu2 %v1211_v6 }
 0x8c9   :  { %v433_v16 = vmul.f32 %v1244_v9, %v430_v10 }
 0x8ca   :  { %v424_v8 = vsub.f32 1.5, %v423_v7 }
 0x8cb   :  { %v436_v19 = vadd.f32 %v1245_v15, %v433_v16 }
 0x8cc   :  { %v425_v11 = vmul.f32 %v1284_v2, %v424_v8 }
 0x8ce   :  { %v429_v12 = vsel %vm428_vm0, %v1284_v2, %v425_v11 }
 0x8cf   :  { %v431_v17 = vmul.f32 %v429_v12, %v397_v51 }
 0x8d1   :  { %v434_v18 = vmul.f32 %v1244_v9, %v431_v17  ;;  %v1210_v9 = vld [vmem:[%s1722_s5 + $0x10] sm:$0xff] }
 0x8d2   :  { %632 = vmatpush.bf16.msra.mxu2 %v1210_v9 }
 0x8d3   :  { %v437_v20 = vadd.f32 %v1245_v15, %v434_v18 }
 0x8d5   :  { %v438_v22 = vpack.c.bf16 %v437_v20, %v436_v19 }
 0x8d7   :  { %1112 = vmatmul.msk.bf16.vlgmr.msra.gmra.mxu3 %vm95_vm2, %v438_v22 }
 0x95a   :  { %v468_v28 = vpop.f32.mrf.mxu3 }
 0x95b   :  { %v469_v29 = vadd.f32 %v1246_v27, %v468_v28 }
 0x95d   :  { %v475_v31 = vmul.f32 0.044715, %v469_v29  ;;  %v473_v47 = vmul.f32 0.5, %v469_v29 }
 0x95f   :  { %v477_v32 = vmul.f32 %v475_v31, %v469_v29 }
 0x961   :  { %v479_v33 = vmul.f32 %v477_v32, %v469_v29 }
 0x962   :  { %v470_v34 = vpop.f32.mrf.mxu3 }
 0x963   :  { %v481_v35 = vadd.f32 %v479_v33, %v469_v29  ;;  %v471_v36 = vadd.f32 %v1246_v27, %v470_v34  ;;  %v1248_v29 = vld [vmem:[%s1721_s4 + $0x9] ss:$0 sm:$0xff]  ;;  %v1249_v34 = vld [vmem:[%s1721_s4 + $0xa] ss:$0 sm:$0xff] }
 0x965   :  { %v476_v37 = vmul.f32 0.044715, %v471_v36  ;;  %v483_v39 = vmul.f32 0.7978846, %v481_v35  ;;  %v474_v48 = vmul.f32 0.5, %v471_v36 }
 0x967   :  { %v478_v40 = vmul.f32 %v476_v37, %v471_v36  ;;  %1285 = vtanh.f32 %v483_v39 }
 0x969   :  { %v480_v41 = vmul.f32 %v478_v40, %v471_v36 }
 0x96b   :  { %v482_v42 = vadd.f32 %v480_v41, %v471_v36 }
 0x96d   :  { %v484_v43 = vmul.f32 0.7978846, %v482_v42  ;;  %v1286_v44 = vpop.eup %1285 }
 0x96e   :  { %v487_v45 = vadd.f32 1.0, %v1286_v44 }
 0x96f   :  { %1287 = vtanh.f32 %v484_v43  ;;  %v1250_v43 = vld [vmem:[%s1721_s4 + $0xb] ss:$0 sm:$0xff] }
 0x970   :  { %v489_v50 = vmul.f32 %v487_v45, %v473_v47 }
 0x975   :  { %v1288_v46 = vpop.eup %1287 }
 0x976   :  { %v488_v49 = vadd.f32 1.0, %v1288_v46 }
 0x978   :  { %v490_v13 = vmul.f32 %v488_v49, %v474_v48 }
 0x97a   :  { %v491_v51 = vpack.c.bf16 %v490_v13, %v489_v50 }
 0x97c   :  { %1129 = vmatmul.msk.bf16.vlgmr.msra.gmra.mxu1 %vm525_vm1, %v491_v51 }
 0x9f9   :  { %v538_v53 = vpop.f32.mrf.mxu1 }
 0x9fa   :  { %v539_v14 = vadd.f32 %v1247_v52, %v538_v53 }
 0x9fc   :  { %v543_v54 = vadd.f32 %v539_v14, %v436_v19 }
 0x9fe   :  { %v545_v55 = vsel %vm95_vm2, %v543_v54, 0.0 }
 0x9ff   :  { %546 = vadd.xlane.f32.xlu2 %v545_v55 }
 0xa01   :  { %v540_v56 = vpop.f32.mrf.mxu1 }
 0xa02   :  { %v541_v57 = vadd.f32 %v1247_v52, %v540_v56 }
 0xa04   :  { %v544_v58 = vadd.f32 %v541_v57, %v437_v20 }
 0xa06   :  { %v548_v59 = vsel %vm95_vm2, %v544_v58, 0.0 }
 0xa07   :  { %549 = vadd.xlane.f32.xlu1 %v548_v59 }
 0xa72   :  { %v547_v60 = vpop.xlane.xlu2 %546 }
 0xa73   :  { %v551_v61 = vmul.f32 %v547_v60, %v1447_v38 }
 0xa75   :  { %v553_v62 = vsub.f32 %v543_v54, %v551_v61 }
 0xa77   :  { %v555_v63 = vmul.f32 %v553_v62, %v553_v62 }
 0xa79   :  { %v557_v0 = vsel %vm95_vm2, %v555_v63, 0.0 }
 0xa7a   :  { %v550_v1 = vpop.xlane.xlu1 %549  ;;  %558 = vadd.xlane.f32.xlu1 %v557_v0 }
 0xa7b   :  { %v552_v2 = vmul.f32 %v550_v1, %v1447_v38 }
 0xa7d   :  { %v554_v3 = vsub.f32 %v544_v58, %v552_v2 }
 0xa7f   :  { %v556_v4 = vmul.f32 %v554_v3, %v554_v3 }
 0xa81   :  { %v560_v5 = vsel %vm95_vm2, %v556_v4, 0.0 }
 0xa82   :  { %561 = vadd.xlane.f32.xlu1 %v560_v5 }
 0xaed   :  { %v559_v7 = vpop.xlane.xlu1 %558 }
 0xaee   :  { %v563_v8 = vmul.f32 %v559_v7, %v1447_v38 }
 0xaf0   :  { %v565_v10 = vadd.f32 1e-12, %v563_v8 }
 0xaf2   :  { %1289 = vrsqrt.f32 %v565_v10  ;;  %vm573_vm4 = vweird.f32 %v565_v10 }
 0xaf5   :  { %v562_v11 = vpop.xlane.xlu1 %561 }
 0xaf6   :  { %v564_v12 = vmul.f32 %v562_v11, %v1447_v38 }
 0xaf8   :  { %v1290_v15 = vpop.eup %1289  ;;  %v566_v16 = vadd.f32 1e-12, %v564_v12 }
 0xaf9   :  { %v568_v17 = vmul.f32 %v1290_v15, %v565_v10  ;;  %vm574_vm3 = vweird.f32 %v1290_v15 }
 0xafa   :  { %1291 = vrsqrt.f32 %v566_v16  ;;  %vm575_vm5 = vmor %vm573_vm4, %vm574_vm3  ;;  %vm583_vm7 = vweird.f32 %v566_v16 }
 0xafb   :  { %v569_v18 = vmul.f32 %v1290_v15, %v568_v17 }
 0xafd   :  { %v570_v19 = vmul.f32 0.5, %v569_v18 }
 0xaff   :  { %v571_v20 = vsub.f32 1.5, %v570_v19 }
 0xb00   :  { %v1292_v22 = vpop.eup %1291 }
 0xb01   :  { %v572_v23 = vmul.f32 %v1290_v15, %v571_v20  ;;  %v578_v24 = vmul.f32 %v1292_v22, %v566_v16  ;;  %vm584_vm6 = vweird.f32 %v1292_v22 }
 0xb02   :  { %vm585_vm8 = vmor %vm583_vm7, %vm584_vm6 }
 0xb03   :  { %v579_v21 = vmul.f32 %v1292_v22, %v578_v24  ;;  %v576_v26 = vsel %vm575_vm5, %v1290_v15, %v572_v23 }
 0xb04   :  { %v587_v31 = vmul.f32 %v576_v26, %v553_v62 }
 0xb05   :  { %v580_v27 = vmul.f32 0.5, %v579_v21 }
 0xb06   :  { %v590_v35 = vmul.f32 %v1248_v29, %v587_v31 }
 0xb07   :  { %v581_v28 = vsub.f32 1.5, %v580_v27 }
 0xb08   :  { %v1593_v39 = vadd.f32 %v1249_v34, %v590_v35 }
 0xb09   :  { %v582_v32 = vmul.f32 %v1292_v22, %v581_v28 }
 0xb0b   :  { %v586_v33 = vsel %vm585_vm8, %v1292_v22, %v582_v32 }
 0xb0c   :  { %v588_v36 = vmul.f32 %v586_v33, %v554_v3 }
 0xb0e   :  { %v591_v37 = vmul.f32 %v1248_v29, %v588_v36 }
 0xb10   :  { %v1595_v40 = vadd.f32 %v1249_v34, %v591_v37 }
 0xb12   :  { %v603_v41 = vpack.c.bf16 %v1595_v40, %v1593_v39 }
 0xb14   :  { %1142 = vmatmul.msk.bf16.vlgmr.msra.gmra.mxu2 %vm95_vm2, %v603_v41 }
 0xb97   :  { %v634_v42 = vpop.f32.mrf.mxu2 }
 0xb98   :  { %v635_v45 = vadd.f32 %v1250_v43, %v634_v42 }
 0xb9f   :  { %v636_v44 = vpop.f32.mrf.mxu2 }
 0xba0   :  { %v637_v46 = vadd.f32 %v1250_v43, %v636_v44  ;;  %v1213_v44 = vld [vmem:[%s1724_s6 + $0x18] sm:$0xff] }
 0xba2   :  { %v639_v47 = vpack.c.bf16 %v637_v46, %v635_v45 }
 0xba4   :  { %641 = vrot.lane.b32.xlu2 %v639_v47, %s1324_s19  ;;  %710 = vrot.lane.b32.xlu1 %v639_v47, %s1326_s25 }
 0xba5   :  { %712 = vrot.lane.b32.xlu0 %v639_v47, %s1327_s3 }
 0xbfe   :  { %v642_v48 = vpop.permute.xlu2 %641 }
 0xbff   :  { %v647_v49 = vsel %vm202_vm10, %v642_v48, 0  ;;  %v1212_v48 = vld [vmem:[%s1724_s6 + $0x10] sm:$0xff] }
 0xc00   :  { %656 = vmatpush.bf16.xpose.msrb.mxu0 %v647_v49 }
 0xc07   :  { %1143 = vmatmul.msk.bf16.vlgmr.msrb.gmra.mxu0 %vm202_vm10, %v639_v47 }
 0xc08   :  { %819 = vmatpush.bf16.msra.mxu0 %v1213_v44  ;;  %v1219_v44 = vld [vmem:[%s1726_s8 + $0x38] sm:$0xff] }
 0xc0c   :  { %820 = vmatpush.bf16.msra.mxu0 %v1212_v48  ;;  %v1254_v48 = vld [vmem:[%s1721_s4 + $0xf] ss:$0 sm:$0xff] }
 0xc16   :  { %v711_v51 = vpop.permute.xlu1 %710 }
 0xc17   :  { %v713_v50 = vpop.permute.xlu0 %712 }
 0xc18   :  { %v718_v13 = vsel %vm202_vm10, %v713_v50, 0 }
 0xc19   :  { %727 = vmatpush.bf16.xpose.msrb.mxu1 %v718_v13 }
 0xc20   :  { %1145 = vmatmul.msk.bf16.vlgmr.msrb.gmra.mxu1 %vm202_vm10, %v711_v51 }
 0xc21   :  { %975 = vmatpush.bf16.msra.mxu1 %v1219_v44 }
 0xc84   :  { %v658_v52 = vpop.f32.mrf.mxu0 }
 0xc85   :  { %v663_v53 = vmul.f32 0.25, %v658_v52 }
 0xc87   :  { %v665_v14 = vadd.f32 %v663_v53, %v1487_v25 }
 0xc89   :  { %v667_v54 = vsel %vm202_vm10, %v665_v14, -inf }
 0xc8a   :  { %668 = vmax.xlane.f32.xlu2 %v667_v54 }
 0xc8c   :  { %v660_v57 = vpop.f32.mrf.mxu0 }
 0xc8d   :  { %v664_v59 = vmul.f32 0.25, %v660_v57 }
 0xc8f   :  { %v666_v63 = vadd.f32 %v664_v59, %v1494_v30 }
 0xc91   :  { %v670_v1 = vsel %vm202_vm10, %v666_v63, -inf }
 0xc9d   :  { %v729_v55 = vpop.f32.mrf.mxu1 }
 0xc9e   :  { %v734_v56 = vmul.f32 0.25, %v729_v55  ;;  %v1251_v55 = vld [vmem:[%s1721_s4 + $0xc] ss:$0 sm:$0xff] }
 0xca0   :  { %v736_v58 = vadd.f32 %v734_v56, %v1487_v25 }
 0xca2   :  { %v738_v60 = vsel %vm202_vm10, %v736_v58, -inf }
 0xca3   :  { %739 = vmax.xlane.f32.xlu0 %v738_v60 }
 0xca5   :  { %v731_v61 = vpop.f32.mrf.mxu1 }
 0xca6   :  { %v735_v62 = vmul.f32 0.25, %v731_v61 }
 0xca8   :  { %v737_v0 = vadd.f32 %v735_v62, %v1494_v30 }
 0xcaa   :  { %v741_v2 = vsel %vm202_vm10, %v737_v0, -inf }
 0xcab   :  { %671 = vmax.xlane.f32.xlu0 %v670_v1  ;;  %742 = vmax.xlane.f32.xlu1 %v741_v2 }
 0xcfd   :  { %v669_v7 = vpop.xlane.xlu2 %668 }
 0xcfe   :  { %v673_v15 = vsub.f32 %v665_v14, %v669_v7 }
 0xd00   :  { %v675_v16 = vmul.f32 1.442695, %v673_v15 }
 0xd16   :  { %v740_v3 = vpop.xlane.xlu0 %739 }
 0xd17   :  { %v744_v4 = vsub.f32 %v736_v58, %v740_v3 }
 0xd19   :  { %v746_v5 = vmul.f32 1.442695, %v744_v4 }
 0xd1b   :  { %1293 = vpow2.f32 %v746_v5 }
 0xd1e   :  { %v672_v25 = vpop.xlane.xlu0 %671  ;;  %v743_v6 = vpop.xlane.xlu1 %742 }
 0xd1f   :  { %v674_v8 = vsub.f32 %v666_v63, %v672_v25  ;;  %v745_v9 = vsub.f32 %v737_v0, %v743_v6 }
 0xd21   :  { %v1294_v10 = vpop.eup %1293  ;;  %v677_v11 = vmul.f32 1.442695, %v674_v8  ;;  %v748_v12 = vmul.f32 1.442695, %v745_v9 }
 0xd22   :  { %v750_v30 = vsel %vm202_vm10, %v1294_v10, 0.0 }
 0xd23   :  { %1295 = vpow2.f32 %v677_v11  ;;  %751 = vadd.xlane.f32.xlu0 %v750_v30  ;;  %v1214_v11 = vld [vmem:[%s1725_s7 + $0x10] sm:$0xff] }
 0xd24   :  { %1297 = vpow2.f32 %v748_v12 }
 0xd25   :  { %1299 = vpow2.f32 %v675_v16 }
 0xd29   :  { %v1296_v17 = vpop.eup %1295 }
 0xd2a   :  { %v1298_v18 = vpop.eup %1297  ;;  %v682_v19 = vsel %vm202_vm10, %v1296_v17, 0.0 }
 0xd2b   :  { %683 = vadd.xlane.f32.xlu2 %v682_v19  ;;  %v753_v20 = vsel %vm202_vm10, %v1298_v18, 0.0  ;;  %v1300_v22 = vpop.eup %1299 }
 0xd2c   :  { %754 = vadd.xlane.f32.xlu1 %v753_v20  ;;  %v679_v23 = vsel %vm202_vm10, %v1300_v22, 0.0 }
 0xd34   :  { %680 = vadd.xlane.f32.xlu1 %v679_v23 }
 0xd37   :  { %761 = vrot.lane.b32.xlu0 %v639_v47, %s1328_s26 }
 0xd4d   :  { %690 = vrot.lane.b32.xlu1 %v639_v47, %s1325_s24 }
 0xd96   :  { %v752_v24 = vpop.xlane.xlu0 %751 }
 0xd97   :  { %1301 = vrcp.f32 %v752_v24 }
 0xd9d   :  { %v1302_v26 = vpop.eup %1301 }
 0xd9e   :  { %v758_v29 = vmul.f32 %v1302_v26, %v1294_v10  ;;  %v684_v34 = vpop.xlane.xlu2 %683 }
 0xd9f   :  { %v755_v21 = vpop.xlane.xlu1 %754 }
 0xda0   :  { %1303 = vrcp.f32 %v755_v21 }
 0xda6   :  { %v1304_v27 = vpop.eup %1303 }
 0xda7   :  { %v759_v28 = vmul.f32 %v1304_v27, %v1298_v18  ;;  %v681_v33 = vpop.xlane.xlu1 %680 }
 0xda8   :  { %1305 = vrcp.f32 %v681_v33 }
 0xda9   :  { %v762_v31 = vpop.permute.xlu0 %761  ;;  %v760_v32 = vpack.c.bf16 %v759_v28, %v758_v29  ;;  %1307 = vrcp.f32 %v684_v34  ;;  %v1252_v29 = vld [vmem:[%s1721_s4 + $0xd] ss:$0 sm:$0xff]  ;;  %v1253_v34 = vld [vmem:[%s1721_s4 + $0xe] ss:$0 sm:$0xff] }
 0xdaa   :  { %774 = vmatpush.bf16.msrb.mxu2 %v762_v31 }
 0xdad   :  { %1146 = vmatmul.msk.bf16.vlgmr.msrb.gmra.mxu2 %vm202_vm10, %v760_v32 }
 0xdae   :  { %v1306_v35 = vpop.eup %1305 }
 0xdaf   :  { %v1308_v36 = vpop.eup %1307  ;;  %v687_v37 = vmul.f32 %v1306_v35, %v1300_v22 }
 0xdb0   :  { %v688_v41 = vmul.f32 %v1308_v36, %v1296_v17 }
 0xdb2   :  { %v689_v43 = vpack.c.bf16 %v688_v41, %v687_v37 }
 0xdbf   :  { %v691_v42 = vpop.permute.xlu1 %690 }
 0xdc0   :  { %703 = vmatpush.bf16.msrb.mxu3 %v691_v42 }
 0xdc3   :  { %1144 = vmatmul.msk.bf16.vlgmr.msrb.gmra.mxu3 %vm202_vm10, %v689_v43 }
 0xe30   :  { %v776_v45 = vpop.f32.mrf.mxu2 }
 0xe38   :  { %v778_v46 = vpop.f32.mrf.mxu2 }
 0xe39   :  { %v1235_v47 = vpack.i.bf16 %v778_v46, %v776_v45  ;;  %v1218_v45 = vld [vmem:[%s1726_s8 + $0x30] sm:$0xff]  ;;  %v1217_v46 = vld [vmem:[%s1726_s8 + $0x28] sm:$0xff] }
 0xe3a   :  { %976 = vmatpush.bf16.msra.mxu1 %v1218_v45 }
 0xe3b   :  { %1236 = vrot.lane.b32.xlu2 %v1235_v47, %s1329_s29  ;;  %v1216_v47 = vld [vmem:[%s1726_s8 + $0x20] sm:$0xff] }
 0xe3e   :  { %977 = vmatpush.bf16.msra.mxu1 %v1217_v46  ;;  %v1256_v46 = vld [vmem:[%s1721_s4 + $0x11] ss:$0 sm:$0xff] }
 0xe42   :  { %978 = vmatpush.bf16.msra.mxu1 %v1216_v47 }
 0xe46   :  { %v705_v49 = vpop.f32.mrf.mxu3 }
 0xe4e   :  { %v707_v52 = vpop.f32.mrf.mxu3 }
 0xe95   :  { %v1237_v50 = vpop.permute.xlu2 %1236 }
 0xe96   :  { %v1239_v13 = vunpack.i.h.bf16 %v1237_v50  ;;  %v1238_v51 = vunpack.i.l.bf16 %v1237_v50 }
 0xe98   :  { %v789_v53 = vsel %vm202_vm10, %v705_v49, %v1238_v51  ;;  %v790_v14 = vsel %vm202_vm10, %v707_v52, %v1239_v13 }
 0xe99   :  { %v791_v54 = vpack.c.bf16 %v790_v14, %v789_v53 }
 0xe9b   :  { %1159 = vmatmul.msk.bf16.vlgmr.msra.gmra.mxu0 %vm95_vm2, %v791_v54 }
 0xf18   :  { %v822_v56 = vpop.f32.mrf.mxu0 }
 0xf19   :  { %v823_v57 = vadd.f32 %v1251_v55, %v822_v56 }
 0xf1b   :  { %v827_v58 = vadd.f32 %v823_v57, %v1593_v39 }
 0xf1d   :  { %v829_v59 = vsel %vm95_vm2, %v827_v58, 0.0 }
 0xf1e   :  { %830 = vadd.xlane.f32.xlu0 %v829_v59 }
 0xf20   :  { %v824_v60 = vpop.f32.mrf.mxu0 }
 0xf21   :  { %v825_v61 = vadd.f32 %v1251_v55, %v824_v60 }
 0xf23   :  { %v828_v62 = vadd.f32 %v825_v61, %v1595_v40  ;;  %v1215_v40 = vld [vmem:[%s1725_s7 + $0x18] sm:$0xff] }
 0xf24   :  { %907 = vmatpush.bf16.msra.mxu3 %v1215_v40 }
 0xf25   :  { %v832_v63 = vsel %vm95_vm2, %v828_v62, 0.0 }
 0xf26   :  { %833 = vadd.xlane.f32.xlu1 %v832_v63 }
 0xf28   :  { %908 = vmatpush.bf16.msra.mxu3 %v1214_v11 }
 0xf91   :  { %v831_v0 = vpop.xlane.xlu0 %830 }
 0xf92   :  { %v835_v1 = vmul.f32 %v831_v0, %v1447_v38 }
 0xf94   :  { %v837_v2 = vsub.f32 %v827_v58, %v835_v1 }
 0xf96   :  { %v839_v3 = vmul.f32 %v837_v2, %v837_v2 }
 0xf98   :  { %v841_v4 = vsel %vm95_vm2, %v839_v3, 0.0 }
 0xf99   :  { %v834_v5 = vpop.xlane.xlu1 %833  ;;  %842 = vadd.xlane.f32.xlu2 %v841_v4 }
 0xf9a   :  { %v836_v39 = vmul.f32 %v834_v5, %v1447_v38 }
 0xf9c   :  { %v838_v25 = vsub.f32 %v828_v62, %v836_v39  ;;  %v1255_v39 = vld [vmem:[%s1721_s4 + $0x10] ss:$0 sm:$0xff] }
 0xf9e   :  { %v840_v6 = vmul.f32 %v838_v25, %v838_v25 }
 0xfa0   :  { %v844_v7 = vsel %vm95_vm2, %v840_v6, 0.0 }
 0xfa1   :  { %845 = vadd.xlane.f32.xlu0 %v844_v7 }
0x100c   :  { %v843_v8 = vpop.xlane.xlu2 %842 }
0x100d   :  { %v847_v9 = vmul.f32 %v843_v8, %v1447_v38 }
0x100f   :  { %v849_v10 = vadd.f32 1e-12, %v847_v9 }
0x1011   :  { %1309 = vrsqrt.f32 %v849_v10  ;;  %vm857_vm10 = vweird.f32 %v849_v10 }
0x1014   :  { %v846_v12 = vpop.xlane.xlu0 %845 }
0x1015   :  { %v848_v15 = vmul.f32 %v846_v12, %v1447_v38 }
0x1017   :  { %v1310_v30 = vpop.eup %1309  ;;  %v850_v16 = vadd.f32 1e-12, %v848_v15 }
0x1018   :  { %v852_v17 = vmul.f32 %v1310_v30, %v849_v10  ;;  %vm858_vm9 = vweird.f32 %v1310_v30 }
0x1019   :  { %1311 = vrsqrt.f32 %v850_v16  ;;  %vm859_vm11 = vmor %vm857_vm10, %vm858_vm9  ;;  %vm867_vm13 = vweird.f32 %v850_v16 }
0x101a   :  { %v853_v18 = vmul.f32 %v1310_v30, %v852_v17 }
0x101c   :  { %v854_v19 = vmul.f32 0.5, %v853_v18 }
0x101e   :  { %v855_v20 = vsub.f32 1.5, %v854_v19 }
0x101f   :  { %v1312_v22 = vpop.eup %1311 }
0x1020   :  { %v856_v23 = vmul.f32 %v1310_v30, %v855_v20  ;;  %v862_v24 = vmul.f32 %v1312_v22, %v850_v16  ;;  %vm868_vm12 = vweird.f32 %v1312_v22 }
0x1021   :  { %vm869_vm14 = vmor %vm867_vm13, %vm868_vm12 }
0x1022   :  { %v863_v21 = vmul.f32 %v1312_v22, %v862_v24  ;;  %v860_v26 = vsel %vm859_vm11, %v1310_v30, %v856_v23  ;;  %v1041_v24 = vld [vmem:[%s1727_s9 + $0x18] sm:$0xff] }
0x1023   :  { %v871_v31 = vmul.f32 %v860_v26, %v837_v2  ;;  %1061 = vmatpush.msra.mxu2 %v1041_v24  ;;  %v1039_v26 = vld [vmem:[%s1727_s9 + $0x8] sm:$0xff] }
0x1024   :  { %v864_v27 = vmul.f32 0.5, %v863_v21  ;;  %v1040_v21 = vld [vmem:[%s1727_s9 + $0x10] sm:$0xff] }
0x1025   :  { %v874_v35 = vmul.f32 %v1252_v29, %v871_v31  ;;  %1062 = vmatpush.msra.mxu2 %v1040_v21 }
0x1026   :  { %v865_v28 = vsub.f32 1.5, %v864_v27  ;;  %v1038_v27 = vld [vmem:[%s1727_s9] sm:$0xff] }
0x1027   :  { %v877_v41 = vadd.f32 %v1253_v34, %v874_v35  ;;  %1063 = vmatpush.msra.mxu2 %v1039_v26 }
0x1028   :  { %v866_v32 = vmul.f32 %v1312_v22, %v865_v28 }
0x1029   :  { %1064 = vmatpush.msra.mxu2 %v1038_v27 }
0x102a   :  { %v870_v33 = vsel %vm869_vm14, %v1312_v22, %v866_v32 }
0x102b   :  { %v872_v36 = vmul.f32 %v870_v33, %v838_v25 }
0x102d   :  { %v875_v37 = vmul.f32 %v1252_v29, %v872_v36 }
0x102f   :  { %v878_v42 = vadd.f32 %v1253_v34, %v875_v37 }
0x1031   :  { %v879_v43 = vpack.c.bf16 %v878_v42, %v877_v41 }
0x1033   :  { %1172 = vmatmul.msk.bf16.vlgmr.msra.gmra.mxu3 %vm95_vm2, %v879_v43 }
0x10b6   :  { %v910_v49 = vpop.f32.mrf.mxu3 }
0x10b7   :  { %v911_v50 = vadd.f32 %v1254_v48, %v910_v49  ;;  %v1257_v49 = vld [vmem:[%s1721_s4 + $0x12] ss:$0 sm:$0xff] }
0x10b9   :  { %v917_v13 = vmul.f32 0.044715, %v911_v50  ;;  %v915_v0 = vmul.f32 0.5, %v911_v50 }
0x10bb   :  { %v919_v51 = vmul.f32 %v917_v13, %v911_v50 }
0x10bd   :  { %v921_v52 = vmul.f32 %v919_v51, %v911_v50 }
0x10be   :  { %v912_v53 = vpop.f32.mrf.mxu3 }
0x10bf   :  { %v923_v14 = vadd.f32 %v921_v52, %v911_v50  ;;  %v913_v54 = vadd.f32 %v1254_v48, %v912_v53 }
0x10c1   :  { %v918_v55 = vmul.f32 0.044715, %v913_v54  ;;  %v925_v56 = vmul.f32 0.7978846, %v923_v14  ;;  %v916_v1 = vmul.f32 0.5, %v913_v54 }
0x10c3   :  { %v920_v57 = vmul.f32 %v918_v55, %v913_v54  ;;  %1313 = vtanh.f32 %v925_v56 }
0x10c5   :  { %v922_v58 = vmul.f32 %v920_v57, %v913_v54  ;;  %v1258_v57 = vld [vmem:[%s1721_s4 + $0x2] ss:$0 sm:$0xff] }
0x10c7   :  { %v924_v59 = vadd.f32 %v922_v58, %v913_v54 }
0x10c9   :  { %v926_v60 = vmul.f32 0.7978846, %v924_v59  ;;  %v1314_v61 = vpop.eup %1313 }
0x10ca   :  { %v929_v62 = vadd.f32 1.0, %v1314_v61 }
0x10cb   :  { %1315 = vtanh.f32 %v926_v60 }
0x10cc   :  { %v931_v3 = vmul.f32 %v929_v62, %v915_v0 }
0x10d1   :  { %v1316_v63 = vpop.eup %1315 }
0x10d2   :  { %v930_v2 = vadd.f32 1.0, %v1316_v63 }
0x10d4   :  { %v932_v4 = vmul.f32 %v930_v2, %v916_v1 }
0x10d6   :  { %v933_v5 = vpack.c.bf16 %v932_v4, %v931_v3 }
0x10d8   :  { %1197 = vmatmul.msk.bf16.vlgmr.msra.gmra.mxu1 %vm525_vm1, %v933_v5 }
0x1155   :  { %v980_v25 = vpop.f32.mrf.mxu1 }
0x1156   :  { %v981_v6 = vadd.f32 %v1255_v39, %v980_v25 }
0x1158   :  { %v985_v7 = vadd.f32 %v981_v6, %v877_v41 }
0x115a   :  { %v987_v40 = vsel %vm95_vm2, %v985_v7, 0.0 }
0x115b   :  { %988 = vadd.xlane.f32.xlu0 %v987_v40 }
0x115d   :  { %v982_v8 = vpop.f32.mrf.mxu1 }
0x115e   :  { %v983_v9 = vadd.f32 %v1255_v39, %v982_v8 }
0x1160   :  { %v986_v10 = vadd.f32 %v983_v9, %v878_v42 }
0x1162   :  { %v990_v11 = vsel %vm95_vm2, %v986_v10, 0.0 }
0x1163   :  { %991 = vadd.xlane.f32.xlu1 %v990_v11 }
0x11ce   :  { %v989_v12 = vpop.xlane.xlu0 %988 }
0x11cf   :  { %v993_v15 = vmul.f32 %v989_v12, %v1447_v38 }
0x11d1   :  { %v995_v30 = vsub.f32 %v985_v7, %v993_v15 }
0x11d3   :  { %v997_v16 = vmul.f32 %v995_v30, %v995_v30 }
0x11d5   :  { %v999_v17 = vsel %vm95_vm2, %v997_v16, 0.0 }
0x11d6   :  { %v992_v18 = vpop.xlane.xlu1 %991  ;;  %1000 = vadd.xlane.f32.xlu0 %v999_v17 }
0x11d7   :  { %v994_v19 = vmul.f32 %v992_v18, %v1447_v38 }
0x11d9   :  { %v996_v20 = vsub.f32 %v986_v10, %v994_v19 }
0x11db   :  { %v998_v22 = vmul.f32 %v996_v20, %v996_v20 }
0x11dd   :  { %v1002_v23 = vsel %vm95_vm2, %v998_v22, 0.0 }
0x11de   :  { %1003 = vadd.xlane.f32.xlu2 %v1002_v23 }
0x1249   :  { %v1001_v28 = vpop.xlane.xlu0 %1000 }
0x124a   :  { %v1005_v29 = vmul.f32 %v1001_v28, %v1447_v38 }
0x124c   :  { %v1007_v31 = vadd.f32 1e-12, %v1005_v29 }
0x124e   :  { %1317 = vrsqrt.f32 %v1007_v31  ;;  %vm1015_vm0 = vweird.f32 %v1007_v31 }
0x1251   :  { %v1004_v32 = vpop.xlane.xlu2 %1003 }
0x1252   :  { %v1006_v33 = vmul.f32 %v1004_v32, %v1447_v38 }
0x1254   :  { %v1318_v34 = vpop.eup %1317  ;;  %v1008_v35 = vadd.f32 1e-12, %v1006_v33 }
0x1255   :  { %v1010_v36 = vmul.f32 %v1318_v34, %v1007_v31  ;;  %vm1016_vm15 = vweird.f32 %v1318_v34 }
0x1256   :  { %1319 = vrsqrt.f32 %v1008_v35  ;;  %vm1017_vm1 = vmor %vm1015_vm0, %vm1016_vm15  ;;  %vm1025_vm4 = vweird.f32 %v1008_v35 }
0x1257   :  { %v1011_v37 = vmul.f32 %v1318_v34, %v1010_v36 }
0x1259   :  { %v1012_v41 = vmul.f32 0.5, %v1011_v37 }
0x125b   :  { %v1013_v42 = vsub.f32 1.5, %v1012_v41 }
0x125c   :  { %v1320_v43 = vpop.eup %1319 }
0x125d   :  { %v1014_v44 = vmul.f32 %v1318_v34, %v1013_v42  ;;  %v1020_v45 = vmul.f32 %v1320_v43, %v1008_v35  ;;  %vm1026_vm3 = vweird.f32 %v1320_v43 }
0x125e   :  { %vm1027_vm5 = vmor %vm1025_vm4, %vm1026_vm3 }
0x125f   :  { %v1018_v47 = vsel %vm1017_vm1, %v1318_v34, %v1014_v44  ;;  %v1021_v48 = vmul.f32 %v1320_v43, %v1020_v45 }
0x1260   :  { %v1029_v38 = vmul.f32 %v1018_v47, %v995_v30 }
0x1261   :  { %v1022_v50 = vmul.f32 0.5, %v1021_v48 }
0x1262   :  { %v1032_v13 = vmul.f32 %v1256_v46, %v1029_v38 }
0x1263   :  { %v1023_v51 = vsub.f32 1.5, %v1022_v50 }
0x1264   :  { %v1035_v52 = vadd.f32 %v1257_v49, %v1032_v13 }
0x1265   :  { %v1024_v53 = vmul.f32 %v1320_v43, %v1023_v51 }
0x1266   :  { %1198 = vmatmul.msk.f32.vlgmr.msra.gmra.mxu2 %vm95_vm2, %v1035_v52 }
0x1267   :  { %v1028_v14 = vsel %vm1027_vm5, %v1320_v43, %v1024_v53 }
0x1268   :  { %v1030_v54 = vmul.f32 %v1028_v14, %v996_v20 }
0x126a   :  { %v1033_v55 = vmul.f32 %v1256_v46, %v1030_v54 }
0x126c   :  { %v1036_v56 = vadd.f32 %v1257_v49, %v1033_v55 }
0x126e   :  { %1199 = vmatmul.msk.f32.gmra.mxu2 %vm95_vm2, %v1036_v56 }
0x12e9   :  { %v1066_v58 = vpop.f32.mrf.mxu2 }
0x12ea   :  { %v1067_v59 = vadd.f32 %v1258_v57, %v1066_v58 }
0x12ec   :  { %1072 = vst [vmem:[%s1728_s10] sm:$0xff] %v1067_v59 }
0x12f1   :  { %v1069_v60 = vpop.f32.mrf.mxu2 }
0x12f2   :  { %v1070_v61 = vadd.f32 %v1258_v57, %v1069_v60 }
0x12f4   :  { %1073 = vst [vmem:[%s1728_s10 + $0x8] sm:$0xff] %v1070_v61 }

</bundles_post_ra>
